<compile_context>
chip_gen: v7x
topology: tpu7x:2x2x1
jax: 0.10.0
libtpu: 0.0.40
codegen_flags: <defaults>
</compile_context>

<pallas_src>
import functools

import jax
import jax.numpy as jnp
from jax.experimental import pallas as pl
from jax.experimental.pallas import tpu as pltpu


def _round_up(x, m):
    return (x + m - 1) // m * m


# ---------------------------------------------------------------------------
# Fused Pallas kernel: conv1 + hidden layers + conv2 + log_softmax
# ---------------------------------------------------------------------------
def _gcn_fused_kernel(adj_ref, adjn_ref, x_ref, w1_ref, wh_ref, w2_ref, b_ref,
                      o_ref, *, num_hidden, out_size):
    # conv1 (norm='none', bias=False): H = relu( A @ (X @ W1) )
    xw = jnp.dot(x_ref[...], w1_ref[...], preferred_element_type=jnp.float32)
    h = jnp.maximum(
        jnp.dot(adj_ref[...], xw, preferred_element_type=jnp.float32), 0.0)

    # hidden layers (norm='both', bias=False): H = relu( A_norm @ (H @ Wk) )
    for l in range(num_hidden):
        hw = jnp.dot(h, wh_ref[l], preferred_element_type=jnp.float32)
        h = jnp.maximum(
            jnp.dot(adjn_ref[...], hw, preferred_element_type=jnp.float32), 0.0)

    # conv2 (norm='both', bias=True), then log_softmax over the true classes.
    hw = jnp.dot(h, w2_ref[...], preferred_element_type=jnp.float32)
    logits = jnp.dot(adjn_ref[...], hw, preferred_element_type=jnp.float32)
    logits = logits + b_ref[...]                       # (Np, Fo) + (1, Fo)

    # Mask lane-padding columns so they do not contribute to the softmax.
    col = jax.lax.broadcasted_iota(jnp.int32, logits.shape, 1)
    logits = jnp.where(col < out_size, logits, -1e30)

    m = jnp.max(logits, axis=-1, keepdims=True)
    lse = m + jnp.log(jnp.sum(jnp.exp(logits - m), axis=-1, keepdims=True))
    o_ref[...] = (logits - lse).astype(o_ref.dtype)


# ---------------------------------------------------------------------------
# Wrapper: pad to lane-dense shapes, run one fused pallas_call, slice back
# ---------------------------------------------------------------------------
def gcn_forward(params, adj, adj_norm, features):
    N = adj.shape[0]
    in_size = features.shape[1]
    hid_size = params["w1"].shape[1]
    out_size = params["w2"].shape[1]
    num_hidden = len(params["hidden"])

    f32 = jnp.float32
    Np = _round_up(N, 128)
    Fin = _round_up(in_size, 128)
    Fh = _round_up(hid_size, 128)
    Fo = _round_up(out_size, 128)

    # Zero-padded, lane-dense operands. Zero pad rows/cols are exact no-ops
    # for the matmuls + relu; padded class columns are masked in-kernel.
    adj_p = jnp.zeros((Np, Np), f32).at[:N, :N].set(adj.astype(f32))
    adjn_p = jnp.zeros((Np, Np), f32).at[:N, :N].set(adj_norm.astype(f32))
    x_p = jnp.zeros((Np, Fin), f32).at[:N, :in_size].set(features.astype(f32))
    w1_p = jnp.zeros((Fin, Fh), f32).at[:in_size, :hid_size].set(params["w1"])
    if num_hidden > 0:
        wh_p = jnp.zeros((num_hidden, Fh, Fh), f32)
        for l, w in enumerate(params["hidden"]):
            wh_p = wh_p.at[l, :hid_size, :hid_size].set(w)
    else:
        wh_p = jnp.zeros((1, Fh, Fh), f32)  # dummy, never read in the kernel
    w2_p = jnp.zeros((Fh, Fo), f32).at[:hid_size, :out_size].set(params["w2"])
    b_p = jnp.zeros((1, Fo), f32).at[0, :out_size].set(params["b2"])

    kernel = functools.partial(
        _gcn_fused_kernel, num_hidden=num_hidden, out_size=out_size)

    out_p = pl.pallas_call(
        kernel,
        out_shape=jax.ShapeDtypeStruct((Np, Fo), jnp.float32),
        grid_spec=pltpu.PrefetchScalarGridSpec(
            num_scalar_prefetch=0,
            grid=(1,),
            in_specs=[
                pl.BlockSpec((Np, Np), lambda i: (0, 0)),                 # adj
                pl.BlockSpec((Np, Np), lambda i: (0, 0)),                 # adj_norm
                pl.BlockSpec((Np, Fin), lambda i: (0, 0)),                # features
                pl.BlockSpec((Fin, Fh), lambda i: (0, 0)),                # W1
                pl.BlockSpec((wh_p.shape[0], Fh, Fh), lambda i: (0, 0, 0)),  # hidden Ws
                pl.BlockSpec((Fh, Fo), lambda i: (0, 0)),                 # W2
                pl.BlockSpec((1, Fo), lambda i: (0, 0)),                  # bias
            ],
            out_specs=pl.BlockSpec((Np, Fo), lambda i: (0, 0)),
        ),
        compiler_params=pltpu.CompilerParams(
            dimension_semantics=("arbitrary",),
        ),
    )(adj_p, adjn_p, x_p, w1_p, wh_p, w2_p, b_p)

    return out_p[:N, :out_size]


# ---------------------------------------------------------------------------
# Params init (glorot-uniform, matching DGL GraphConv shapes)
# ---------------------------------------------------------------------------
def init_gcn_params(key, in_size, hid_size, out_size, num_layers):
    def glorot(k, fan_in, fan_out):
        limit = jnp.sqrt(6.0 / (fan_in + fan_out))
        return jax.random.uniform(k, (fan_in, fan_out), jnp.float32, -limit, limit)

    keys = jax.random.split(key, num_layers)
    params = {"w1": glorot(keys[0], in_size, hid_size), "hidden": []}
    for li in range(num_layers - 2):
        params["hidden"].append(glorot(keys[1 + li], hid_size, hid_size))
    params["w2"] = glorot(keys[-1], hid_size, out_size)
    params["b2"] = jnp.zeros((out_size,), jnp.float32)
    return params


# Pure-JAX reference (for correctness checking only).
def gcn_forward_ref(params, adj, adj_norm, features):
    h = jax.nn.relu(adj @ (features @ params["w1"]))
    for w in params["hidden"]:
        h = jax.nn.relu(adj_norm @ (h @ w))
    y = adj_norm @ (h @ params["w2"]) + params["b2"][None, :]
    return jax.nn.log_softmax(y, axis=1)


# ---------------------------------------------------------------------------
# Main
# ---------------------------------------------------------------------------
if __name__ == "__main__":
    N = 128          # number of nodes
    in_size = 96
    hid_size = 64
    out_size = 16
    num_layers = 4   # conv1 + 2 hidden + conv2
    dropout = 0.5    # eval mode -> identity

    key = jax.random.PRNGKey(0)
    k_adj, k_feat, k_param = jax.random.split(key, 3)

    # Deterministic random undirected graph with self loops (dense adjacency).
    rand = jax.random.uniform(k_adj, (N, N))
    adj = (rand < 0.05).astype(jnp.float32)
    adj = jnp.maximum(adj, adj.T)                            # symmetrize
    adj = jnp.maximum(adj, jnp.eye(N, dtype=jnp.float32))    # self loops

    # Symmetric normalization D^{-1/2} A D^{-1/2} (degrees clamped at 1).
    deg = jnp.clip(jnp.sum(adj, axis=1), 1.0, None)
    d_inv_sqrt = 1.0 / jnp.sqrt(deg)
    adj_norm = d_inv_sqrt[:, None] * adj * d_inv_sqrt[None, :]

    features = jax.random.normal(k_feat, (N, in_size), jnp.float32)
    params = init_gcn_params(k_param, in_size, hid_size, out_size, num_layers)

    out = gcn_forward(params, adj, adj_norm, features)
    out = jax.block_until_ready(out)

    ref = gcn_forward_ref(params, adj, adj_norm, features)
    assert out.shape == (N, out_size)
    assert jnp.allclose(out, ref, atol=1e-4, rtol=1e-4), "mismatch vs reference"

    print("KERNEL_OK")
</pallas_src>

<mosaic_0001>
module attributes {stable_mosaic.version = 11 : i64} {
  func.func @_gcn_fused_kernel(%arg0: i32, %arg1: memref<128x128xf32, #tpu.memory_space<vmem>>, %arg2: memref<128x128xf32, #tpu.memory_space<vmem>>, %arg3: memref<128x128xf32, #tpu.memory_space<vmem>>, %arg4: memref<128x128xf32, #tpu.memory_space<vmem>>, %arg5: memref<2x128x128xf32, #tpu.memory_space<vmem>>, %arg6: memref<128x128xf32, #tpu.memory_space<vmem>>, %arg7: memref<1x128xf32, #tpu.memory_space<vmem>>, %arg8: memref<128x128xf32, #tpu.memory_space<vmem>>) attributes {dimension_semantics = [#tpu.dimension_semantics<arbitrary>], iteration_bounds = array<i64: 1>, scalar_prefetch = 0 : i64, scratch_operands = 0 : i64, tpu.core_type = #tpu.core_type<tc>, window_params = [{pipeline_mode = #tpu.pipeline_mode<synchronous>, transform_indices = @transform_0, window_bounds = array<i64: 128, 128>}, {pipeline_mode = #tpu.pipeline_mode<synchronous>, transform_indices = @transform_1, window_bounds = array<i64: 128, 128>}, {pipeline_mode = #tpu.pipeline_mode<synchronous>, transform_indices = @transform_2, window_bounds = array<i64: 128, 128>}, {pipeline_mode = #tpu.pipeline_mode<synchronous>, transform_indices = @transform_3, window_bounds = array<i64: 128, 128>}, {pipeline_mode = #tpu.pipeline_mode<synchronous>, transform_indices = @transform_4, window_bounds = array<i64: 2, 128, 128>}, {pipeline_mode = #tpu.pipeline_mode<synchronous>, transform_indices = @transform_5, window_bounds = array<i64: 128, 128>}, {pipeline_mode = #tpu.pipeline_mode<synchronous>, transform_indices = @transform_6, window_bounds = array<i64: 1, 128>}, {pipeline_mode = #tpu.pipeline_mode<synchronous>, transform_indices = @transform_7, window_bounds = array<i64: 128, 128>}]} {
    %c0 = arith.constant 0 : index
    %c0_0 = arith.constant 0 : index
    %0 = vector.load %arg3[%c0, %c0_0] : memref<128x128xf32, #tpu.memory_space<vmem>>, vector<128x128xf32>
    %c0_1 = arith.constant 0 : index
    %c0_2 = arith.constant 0 : index
    %1 = vector.load %arg4[%c0_1, %c0_2] : memref<128x128xf32, #tpu.memory_space<vmem>>, vector<128x128xf32>
    %cst = arith.constant dense<0.000000e+00> : vector<128x128xf32>
    %2 = tpu.matmul %0, %1, %cst {dimension_numbers = #tpu.dot_dimension_numbers<[1], [0], [0], [1], [0, 0, 1, 1], [], []>} : vector<128x128xf32>, vector<128x128xf32>, vector<128x128xf32> -> vector<128x128xf32>
    %c0_3 = arith.constant 0 : index
    %c0_4 = arith.constant 0 : index
    %3 = vector.load %arg1[%c0_3, %c0_4] : memref<128x128xf32, #tpu.memory_space<vmem>>, vector<128x128xf32>
    %cst_5 = arith.constant dense<0.000000e+00> : vector<128x128xf32>
    %4 = tpu.matmul %3, %2, %cst_5 {dimension_numbers = #tpu.dot_dimension_numbers<[1], [0], [0], [1], [0, 0, 1, 1], [], []>} : vector<128x128xf32>, vector<128x128xf32>, vector<128x128xf32> -> vector<128x128xf32>
    %cst_6 = arith.constant 0.000000e+00 : f32
    %5 = vector.broadcast %cst_6 : f32 to vector<128x128xf32>
    %6 = arith.maximumf %4, %5 : vector<128x128xf32>
    %c0_7 = arith.constant 0 : index
    %c0_8 = arith.constant 0 : index
    %c0_9 = arith.constant 0 : index
    %7 = vector.load %arg5[%c0_7, %c0_8, %c0_9] : memref<2x128x128xf32, #tpu.memory_space<vmem>>, vector<1x128x128xf32>
    %8 = vector.shape_cast %7 : vector<1x128x128xf32> to vector<128x128xf32>
    %cst_10 = arith.constant dense<0.000000e+00> : vector<128x128xf32>
    %9 = tpu.matmul %6, %8, %cst_10 {dimension_numbers = #tpu.dot_dimension_numbers<[1], [0], [0], [1], [0, 0, 1, 1], [], []>} : vector<128x128xf32>, vector<128x128xf32>, vector<128x128xf32> -> vector<128x128xf32>
    %c0_11 = arith.constant 0 : index
    %c0_12 = arith.constant 0 : index
    %10 = vector.load %arg2[%c0_11, %c0_12] : memref<128x128xf32, #tpu.memory_space<vmem>>, vector<128x128xf32>
    %cst_13 = arith.constant dense<0.000000e+00> : vector<128x128xf32>
    %11 = tpu.matmul %10, %9, %cst_13 {dimension_numbers = #tpu.dot_dimension_numbers<[1], [0], [0], [1], [0, 0, 1, 1], [], []>} : vector<128x128xf32>, vector<128x128xf32>, vector<128x128xf32> -> vector<128x128xf32>
    %cst_14 = arith.constant 0.000000e+00 : f32
    %12 = vector.broadcast %cst_14 : f32 to vector<128x128xf32>
    %13 = arith.maximumf %11, %12 : vector<128x128xf32>
    %c1 = arith.constant 1 : index
    %c0_15 = arith.constant 0 : index
    %c0_16 = arith.constant 0 : index
    %14 = vector.load %arg5[%c1, %c0_15, %c0_16] : memref<2x128x128xf32, #tpu.memory_space<vmem>>, vector<1x128x128xf32>
    %15 = vector.shape_cast %14 : vector<1x128x128xf32> to vector<128x128xf32>
    %cst_17 = arith.constant dense<0.000000e+00> : vector<128x128xf32>
    %16 = tpu.matmul %13, %15, %cst_17 {dimension_numbers = #tpu.dot_dimension_numbers<[1], [0], [0], [1], [0, 0, 1, 1], [], []>} : vector<128x128xf32>, vector<128x128xf32>, vector<128x128xf32> -> vector<128x128xf32>
    %c0_18 = arith.constant 0 : index
    %c0_19 = arith.constant 0 : index
    %17 = vector.load %arg2[%c0_18, %c0_19] : memref<128x128xf32, #tpu.memory_space<vmem>>, vector<128x128xf32>
    %cst_20 = arith.constant dense<0.000000e+00> : vector<128x128xf32>
    %18 = tpu.matmul %17, %16, %cst_20 {dimension_numbers = #tpu.dot_dimension_numbers<[1], [0], [0], [1], [0, 0, 1, 1], [], []>} : vector<128x128xf32>, vector<128x128xf32>, vector<128x128xf32> -> vector<128x128xf32>
    %cst_21 = arith.constant 0.000000e+00 : f32
    %19 = vector.broadcast %cst_21 : f32 to vector<128x128xf32>
    %20 = arith.maximumf %18, %19 : vector<128x128xf32>
    %c0_22 = arith.constant 0 : index
    %c0_23 = arith.constant 0 : index
    %21 = vector.load %arg6[%c0_22, %c0_23] : memref<128x128xf32, #tpu.memory_space<vmem>>, vector<128x128xf32>
    %cst_24 = arith.constant dense<0.000000e+00> : vector<128x128xf32>
    %22 = tpu.matmul %20, %21, %cst_24 {dimension_numbers = #tpu.dot_dimension_numbers<[1], [0], [0], [1], [0, 0, 1, 1], [], []>} : vector<128x128xf32>, vector<128x128xf32>, vector<128x128xf32> -> vector<128x128xf32>
    %c0_25 = arith.constant 0 : index
    %c0_26 = arith.constant 0 : index
    %23 = vector.load %arg2[%c0_25, %c0_26] : memref<128x128xf32, #tpu.memory_space<vmem>>, vector<128x128xf32>
    %cst_27 = arith.constant dense<0.000000e+00> : vector<128x128xf32>
    %24 = tpu.matmul %23, %22, %cst_27 {dimension_numbers = #tpu.dot_dimension_numbers<[1], [0], [0], [1], [0, 0, 1, 1], [], []>} : vector<128x128xf32>, vector<128x128xf32>, vector<128x128xf32> -> vector<128x128xf32>
    %c0_28 = arith.constant 0 : index
    %c0_29 = arith.constant 0 : index
    %25 = vector.load %arg7[%c0_28, %c0_29] : memref<1x128xf32, #tpu.memory_space<vmem>>, vector<1x128xf32>
    %26 = vector.broadcast %25 : vector<1x128xf32> to vector<128x128xf32>
    %27 = arith.addf %24, %26 : vector<128x128xf32>
    %28 = tpu.iota {dimensions = array<i32: 1>} : vector<128x128xi32>
    %c16_i32 = arith.constant 16 : i32
    %29 = vector.broadcast %c16_i32 : i32 to vector<128x128xi32>
    %30 = arith.cmpi slt, %28, %29 : vector<128x128xi32>
    %cst_30 = arith.constant -1.000000e+30 : f32
    %31 = vector.broadcast %cst_30 : f32 to vector<128x128xf32>
    %32 = arith.select %30, %27, %31 : vector<128x128xi1>, vector<128x128xf32>
    %cst_31 = arith.constant dense<0xFF800000> : vector<128xf32>
    %33 = vector.multi_reduction <maximumf>, %32, %cst_31 [1] : vector<128x128xf32> to vector<128xf32>
    %34 = vector.shape_cast %33 : vector<128xf32> to vector<128x1xf32>
    %35 = vector.broadcast %34 : vector<128x1xf32> to vector<128x128xf32>
    %36 = arith.subf %32, %35 : vector<128x128xf32>
    %37 = math.exp %36 : vector<128x128xf32>
    %cst_32 = arith.constant dense<0.000000e+00> : vector<128xf32>
    %38 = vector.multi_reduction <add>, %37, %cst_32 [1] : vector<128x128xf32> to vector<128xf32>
    %39 = vector.shape_cast %38 : vector<128xf32> to vector<128x1xf32>
    %40 = math.log %39 : vector<128x1xf32>
    %41 = arith.addf %34, %40 : vector<128x1xf32>
    %42 = vector.broadcast %41 : vector<128x1xf32> to vector<128x128xf32>
    %43 = arith.subf %32, %42 : vector<128x128xf32>
    %c0_33 = arith.constant 0 : index
    %c0_34 = arith.constant 0 : index
    %44 = vector.load %arg8[%c0_33, %c0_34] : memref<128x128xf32, #tpu.memory_space<vmem>>, vector<128x128xf32>
    tpu.vector_store %arg8[%c0_33, %c0_34], %43 {strides = array<i32>} : memref<128x128xf32, #tpu.memory_space<vmem>>, vector<128x128xf32>,
    return
  }
  func.func @transform_0(%arg0: i32) -> (i32, i32) {
    %c0_i32 = arith.constant 0 : i32
    %c0_i32_0 = arith.constant 0 : i32
    %c0_i32_1 = arith.constant 0 : i32
    return %c0_i32, %c0_i32_0 : i32, i32
  }
  func.func @transform_1(%arg0: i32) -> (i32, i32) {
    %c0_i32 = arith.constant 0 : i32
    %c0_i32_0 = arith.constant 0 : i32
    %c0_i32_1 = arith.constant 0 : i32
    return %c0_i32, %c0_i32_0 : i32, i32
  }
  func.func @transform_2(%arg0: i32) -> (i32, i32) {
    %c0_i32 = arith.constant 0 : i32
    %c0_i32_0 = arith.constant 0 : i32
    %c0_i32_1 = arith.constant 0 : i32
    return %c0_i32, %c0_i32_0 : i32, i32
  }
  func.func @transform_3(%arg0: i32) -> (i32, i32) {
    %c0_i32 = arith.constant 0 : i32
    %c0_i32_0 = arith.constant 0 : i32
    %c0_i32_1 = arith.constant 0 : i32
    return %c0_i32, %c0_i32_0 : i32, i32
  }
  func.func @transform_4(%arg0: i32) -> (i32, i32, i32) {
    %c0_i32 = arith.constant 0 : i32
    %c0_i32_0 = arith.constant 0 : i32
    %c0_i32_1 = arith.constant 0 : i32
    %c0_i32_2 = arith.constant 0 : i32
    return %c0_i32, %c0_i32_0, %c0_i32_1 : i32, i32, i32
  }
  func.func @transform_5(%arg0: i32) -> (i32, i32) {
    %c0_i32 = arith.constant 0 : i32
    %c0_i32_0 = arith.constant 0 : i32
    %c0_i32_1 = arith.constant 0 : i32
    return %c0_i32, %c0_i32_0 : i32, i32
  }
  func.func @transform_6(%arg0: i32) -> (i32, i32) {
    %c0_i32 = arith.constant 0 : i32
    %c0_i32_0 = arith.constant 0 : i32
    %c0_i32_1 = arith.constant 0 : i32
    return %c0_i32, %c0_i32_0 : i32, i32
  }
  func.func @transform_7(%arg0: i32) -> (i32, i32) {
    %c0_i32 = arith.constant 0 : i32
    %c0_i32_0 = arith.constant 0 : i32
    %c0_i32_1 = arith.constant 0 : i32
    return %c0_i32, %c0_i32_0 : i32, i32
  }
}

</mosaic_0001>

<bundles_post_ra>
// kernel: tpu_custom_call.1
= control target key start
LH: loop header
LB: loop body
LE: loop exit
PB: predicated region body
PF: predicated region fallthrough
CT: control target
= control target key end

     0   :  { %12 = vsyncpa [#allocation3], 0  ;;  %s3303_s0 = inlined_call_operand.hbm [shape: f32[128,128], index: 0, kind: input, shape index: {}]   ;;  %s3304_s1 = inlined_call_operand.hbm [shape: f32[128,128], index: 1, kind: input, shape index: {}]   ;;  %s3305_s2 = inlined_call_operand.hbm [shape: f32[128,128], index: 2, kind: input, shape index: {}]   ;;  %s3306_s3 = inlined_call_operand.hbm [shape: f32[128,128], index: 3, kind: input, shape index: {}]   ;;  %s3307_s4 = inlined_call_operand.hbm [shape: f32[2,128,128], index: 4, kind: input, shape index: {}]   ;;  %s3308_s5 = inlined_call_operand.hbm [shape: f32[128,128], index: 5, kind: input, shape index: {}]   ;;  %s3309_s6 = inlined_call_operand.vmem [shape: f32[1,128], index: 6, kind: input, shape index: {}]   ;;  %s3310_s7 = inlined_call_operand.hbm [shape: f32[128,128], index: 7, kind: output, shape index: {}]  }
   0x1   :  { %13 = vsyncpa [#allocation6], 0 }
   0x2   :  { %14 = vsyncpa [#allocation9], 0 }
   0x3   :  { %15 = vsyncpa [#allocation12], 0 }
   0x4   :  { %16 = vsyncpa [#allocation4], 0  ;;  %s2866_s24 = smov [#allocation5]   ;;  %s2867_s26 = smov [#allocation8]  }
   0x5   :  { %s34_s25 = sshll.u32 %s2866_s24, 4  ;;  %s58_s27 = sshll.u32 %s2867_s26, 4  ;;  %s35_s25 = int_to_ptr.vmem [resolvable:$true] %s34_s25  ;;  %s2915_s27 = int_to_ptr.vmem [resolvable:$true] %s58_s27 }
   0x6   :  { %s2702_s30 = scalar_lea.hbm %s3304_s1, 2048 }
   0x7   :  { %p2703_p0 = scmp.ne.s32.totalorder %s3304_s1, %s2702_s30  ;;  %p2706_p1 = scmp.lt.u32.totalorder %s2702_s30, %s3304_s1 }
   0x9   :  { %p2708_p2 = pnand %p2706_p1, %p2703_p0 }
   0xb   :  { %2711 = shalt.err (!%p2708_p2)
}
   0xc   :  { %s2712_s12 = scalar_lea.vmem %s35_s25, 2048  ;;  %p2717_p4 = scmp.lt.s32.totalorder %s35_s25, %s35_s25 }
   0xd   :  { %p2713_p3 = scmp.ne.s32.totalorder %s35_s25, %s2712_s12  ;;  %p2718_p5 = scmp.lt.s32.totalorder %s2712_s12, %s2712_s12 }
   0xf   :  { %p2719_p6 = por %p2718_p5, %p2717_p4 }
  0x11   :  { %p2720_p7 = pnand %p2719_p6, %p2713_p3 }
  0x13   :  { %2723 = shalt.err (!%p2720_p7)
}
  0x14   :  { %s2868_s13 = smov 128   ;;  %s2869_s14 = smov 8  }
  0x15   :  { %40 = dma.hbm_to_vmem [thread:$0]  %s3304_s1, 2048, %s35_s25, [#allocation6], %s2868_s13, %s2868_s13, %s2869_s14  }
  0x16   :  { %s2724_s19 = scalar_lea.hbm %s3306_s3, 2048 }
  0x17   :  { %p2725_p8 = scmp.ne.s32.totalorder %s3306_s3, %s2724_s19  ;;  %p2728_p9 = scmp.lt.u32.totalorder %s2724_s19, %s3306_s3 }
  0x19   :  { %p2730_p10 = pnand %p2728_p9, %p2725_p8 }
  0x1b   :  { %2733 = shalt.err (!%p2730_p10)
}
  0x1c   :  { %s2734_s24 = scalar_lea.vmem %s2915_s27, 2048  ;;  %p2739_p12 = scmp.lt.s32.totalorder %s2915_s27, %s2915_s27 }
  0x1d   :  { %p2735_p11 = scmp.ne.s32.totalorder %s2915_s27, %s2734_s24  ;;  %p2740_p13 = scmp.lt.s32.totalorder %s2734_s24, %s2734_s24 }
  0x1f   :  { %p2741_p0 = por %p2740_p13, %p2739_p12 }
  0x21   :  { %p2742_p1 = pnand %p2741_p0, %p2735_p11 }
  0x23   :  { %2745 = shalt.err (!%p2742_p1)
}
  0x24   :  { %64 = dma.hbm_to_vmem [thread:$0]  %s3306_s3, 2048, %s2915_s27, [#allocation9], %s2868_s13, %s2868_s13, %s2869_s14  }
  0x25   :  { %s2870_s26 = smov [#allocation2]   ;;  %s2871_s29 = smov [#allocation7]  }
  0x26   :  { %s22_s28 = sshll.u32 %s2870_s26, 4  ;;  %s46_s30 = sshll.u32 %s2871_s29, 4  ;;  %s23_s28 = int_to_ptr.vmem [resolvable:$true] %s22_s28  ;;  %s2952_s30 = int_to_ptr.vmem [resolvable:$true] %s46_s30 }
  0x27   :  { %s2746_s10 = scalar_lea.hbm %s3303_s0, 2048 }
  0x28   :  { %p2747_p2 = scmp.ne.s32.totalorder %s3303_s0, %s2746_s10  ;;  %p2750_p3 = scmp.lt.u32.totalorder %s2746_s10, %s3303_s0 }
  0x2a   :  { %p2752_p4 = pnand %p2750_p3, %p2747_p2 }
  0x2c   :  { %2755 = shalt.err (!%p2752_p4)
}
  0x2d   :  { %s2756_s3 = scalar_lea.vmem %s23_s28, 2048  ;;  %p2761_p6 = scmp.lt.s32.totalorder %s23_s28, %s23_s28 }
  0x2e   :  { %p2757_p5 = scmp.ne.s32.totalorder %s23_s28, %s2756_s3  ;;  %p2762_p7 = scmp.lt.s32.totalorder %s2756_s3, %s2756_s3 }
  0x30   :  { %p2763_p8 = por %p2762_p7, %p2761_p6 }
  0x32   :  { %p2764_p9 = pnand %p2763_p8, %p2757_p5 }
  0x34   :  { %2767 = shalt.err (!%p2764_p9)
}
  0x35   :  { %28 = dma.hbm_to_vmem [thread:$0]  %s3303_s0, 2048, %s23_s28, [#allocation3], %s2868_s13, %s2868_s13, %s2869_s14  }
  0x36   :  { %s2768_s20 = scalar_lea.hbm %s3305_s2, 2048 }
  0x37   :  { %p2769_p10 = scmp.ne.s32.totalorder %s3305_s2, %s2768_s20  ;;  %p2772_p11 = scmp.lt.u32.totalorder %s2768_s20, %s3305_s2 }
  0x39   :  { %p2774_p12 = pnand %p2772_p11, %p2769_p10 }
  0x3b   :  { %2777 = shalt.err (!%p2774_p12)
}
  0x3c   :  { %s2778_s1 = scalar_lea.vmem %s2952_s30, 2048  ;;  %p2783_p0 = scmp.lt.s32.totalorder %s2952_s30, %s2952_s30 }
  0x3d   :  { %p2779_p13 = scmp.ne.s32.totalorder %s2952_s30, %s2778_s1  ;;  %p2784_p1 = scmp.lt.s32.totalorder %s2778_s1, %s2778_s1 }
  0x3f   :  { %p2785_p2 = por %p2784_p1, %p2783_p0 }
  0x41   :  { %p2786_p3 = pnand %p2785_p2, %p2779_p13 }
  0x43   :  { %2789 = shalt.err (!%p2786_p3)
}
  0x44   :  { %52 = dma.hbm_to_vmem [thread:$0]  %s3305_s2, 2048, %s2952_s30, [#allocation6], %s2868_s13, %s2868_s13, %s2869_s14  }
  0x45   :  { %s2872_s26 = smov [#allocation10]   ;;  %s2873_s29 = smov [#allocation11]  }
  0x46   :  { %s70_s28 = sshll.u32 %s2872_s26, 4  ;;  %s82_s8 = sshll.u32 %s2873_s29, 4  ;;  %s71_s28 = int_to_ptr.vmem [resolvable:$true] %s70_s28  ;;  %s2989_s8 = int_to_ptr.vmem [resolvable:$true] %s82_s8 }
  0x47   :  { %s2790_s11 = scalar_lea.hbm %s3307_s4, 4096 }
  0x48   :  { %p2791_p4 = scmp.ne.s32.totalorder %s3307_s4, %s2790_s11  ;;  %p2794_p5 = scmp.lt.u32.totalorder %s2790_s11, %s3307_s4 }
  0x4a   :  { %p2796_p6 = pnand %p2794_p5, %p2791_p4 }
  0x4c   :  { %2799 = shalt.err (!%p2796_p6)
}
  0x4d   :  { %s2800_s2 = scalar_lea.vmem %s71_s28, 4096  ;;  %p2805_p8 = scmp.lt.s32.totalorder %s71_s28, %s71_s28 }
  0x4e   :  { %p2801_p7 = scmp.ne.s32.totalorder %s71_s28, %s2800_s2  ;;  %p2806_p9 = scmp.lt.s32.totalorder %s2800_s2, %s2800_s2 }
  0x50   :  { %p2807_p10 = por %p2806_p9, %p2805_p8 }
  0x52   :  { %p2808_p11 = pnand %p2807_p10, %p2801_p7 }
  0x54   :  { %2811 = shalt.err (!%p2808_p11)
}
  0x55   :  { %76 = dma.hbm_to_vmem [thread:$0]  %s3307_s4, 4096, %s71_s28, [#allocation9], %s2868_s13, %s2868_s13, %s2869_s14  }
  0x56   :  { %s2812_s19 = scalar_lea.hbm %s3308_s5, 2048 }
  0x57   :  { %p2813_p12 = scmp.ne.s32.totalorder %s3308_s5, %s2812_s19  ;;  %p2816_p13 = scmp.lt.u32.totalorder %s2812_s19, %s3308_s5 }
  0x59   :  { %p2818_p0 = pnand %p2816_p13, %p2813_p12 }
  0x5b   :  { %2821 = shalt.err (!%p2818_p0)
}
  0x5c   :  { %s2822_s24 = scalar_lea.vmem %s2989_s8, 2048  ;;  %p2827_p2 = scmp.lt.s32.totalorder %s2989_s8, %s2989_s8 }
  0x5d   :  { %p2823_p1 = scmp.ne.s32.totalorder %s2989_s8, %s2822_s24  ;;  %p2828_p3 = scmp.lt.s32.totalorder %s2822_s24, %s2822_s24 }
  0x5f   :  { %p2829_p4 = por %p2828_p3, %p2827_p2 }
  0x61   :  { %p2830_p5 = pnand %p2829_p4, %p2823_p1 }
  0x63   :  { %2833 = shalt.err (!%p2830_p5)
}
  0x64   :  { %88 = dma.hbm_to_vmem [thread:$0]  %s3308_s5, 2048, %s2989_s8, [#allocation12], %s2868_s13, %s2868_s13, %s2869_s14  }
  0x65   :  { %2856 = dma.done.wait [#allocation3], 2048  }
  0x66   :  { %2857 = vsyncadd [#allocation3], 4294965248 }
  0x67   :  { %2858 = dma.done.wait [#allocation6], 4096  }
  0x68   :  { %2859 = vsyncadd [#allocation6], 4294963200 }
  0x69   :  { %2860 = dma.done.wait [#allocation9], 6144  }
  0x6a   :  { %2861 = vsyncadd [#allocation9], 4294961152 }
  0x6b   :  { %2862 = dma.done.wait [#allocation12], 2048  }
  0x6c   :  { %2863 = vsyncadd [#allocation12], 4294965248  ;;  %v125_v0 = vld [vmem:[#allocation8] sm:$0xff]  ;;  %v126_v1 = vld [vmem:[#allocation8 + $0x8] sm:$0xff] }
  0x6d   :  { %v127_v2 = vld [vmem:[#allocation8 + $0x10] sm:$0xff]  ;;  %v2373_v3 = vpack.c.bf16 %v126_v1, %v125_v0  ;;  %v128_v4 = vld [vmem:[#allocation8 + $0x18] sm:$0xff]  ;;  %v129_v6 = vld [vmem:[#allocation8 + $0x20] sm:$0xff] }
  0x6e   :  { %v2377_v5 = vpack.c.bf16 %v128_v4, %v127_v2  ;;  %v130_v7 = vld [vmem:[#allocation8 + $0x28] sm:$0xff]  ;;  %v109_v9 = vld [vmem:[#allocation7] sm:$0xff]  ;;  %v131_v10 = vld [vmem:[#allocation8 + $0x30] sm:$0xff] }
  0x6f   :  { %2374 = vmatprep.subr.bf16.mxu0 %v2373_v3  ;;  %v2381_v8 = vpack.c.bf16 %v130_v7, %v129_v6  ;;  %v132_v11 = vld [vmem:[#allocation8 + $0x38] sm:$0xff]  ;;  %1957 = vmatprep.mubr.f32.mxu0 %v109_v9  ;;  %v133_v13 = vld [vmem:[#allocation8 + $0x40] sm:$0xff]  ;;  %v134_v14 = vld [vmem:[#allocation8 + $0x48] sm:$0xff] }
  0x70   :  { %2376 = vmatpush3.bf16.msra.mxu0 %v2373_v3  ;;  %v2385_v12 = vpack.c.bf16 %v132_v11, %v131_v10  ;;  %v2389_v15 = vpack.c.bf16 %v134_v14, %v133_v13  ;;  %v135_v16 = vld [vmem:[#allocation8 + $0x50] sm:$0xff]  ;;  %v136_v17 = vld [vmem:[#allocation8 + $0x58] sm:$0xff]  ;;  %v137_v19 = vld [vmem:[#allocation8 + $0x60] sm:$0xff] }
  0x71   :  { %2378 = vmatprep.subr.bf16.mxu0 %v2377_v5  ;;  %v2393_v18 = vpack.c.bf16 %v136_v17, %v135_v16  ;;  %v138_v20 = vld [vmem:[#allocation8 + $0x68] sm:$0xff]  ;;  %v139_v22 = vld [vmem:[#allocation8 + $0x70] sm:$0xff]  ;;  %v140_v23 = vld [vmem:[#allocation8 + $0x78] sm:$0xff] }
  0x72   :  { %v2397_v21 = vpack.c.bf16 %v138_v20, %v137_v19  ;;  %v2401_v24 = vpack.c.bf16 %v140_v23, %v139_v22  ;;  %v110_v25 = vld [vmem:[#allocation7 + $0x8] sm:$0xff]  ;;  %v111_v26 = vld [vmem:[#allocation7 + $0x10] sm:$0xff]  ;;  %v112_v27 = vld [vmem:[#allocation7 + $0x18] sm:$0xff] }
  0x73   :  { %v113_v28 = vld [vmem:[#allocation7 + $0x20] sm:$0xff]  ;;  %v114_v29 = vld [vmem:[#allocation7 + $0x28] sm:$0xff]  ;;  %v115_v30 = vld [vmem:[#allocation7 + $0x30] sm:$0xff] }
  0x74   :  { %2380 = vmatpush3.bf16.msra.mxu0 %v2377_v5  ;;  %v116_v31 = vld [vmem:[#allocation7 + $0x38] sm:$0xff]  ;;  %v117_v32 = vld [vmem:[#allocation7 + $0x40] sm:$0xff]  ;;  %v118_v33 = vld [vmem:[#allocation7 + $0x48] sm:$0xff] }
  0x75   :  { %2382 = vmatprep.subr.bf16.mxu0 %v2381_v8  ;;  %v119_v34 = vld [vmem:[#allocation7 + $0x50] sm:$0xff]  ;;  %v120_v35 = vld [vmem:[#allocation7 + $0x58] sm:$0xff]  ;;  %v121_v36 = vld [vmem:[#allocation7 + $0x60] sm:$0xff] }
  0x76   :  { %v122_v37 = vld [vmem:[#allocation7 + $0x68] sm:$0xff]  ;;  %v123_v38 = vld [vmem:[#allocation7 + $0x70] sm:$0xff]  ;;  %v124_v39 = vld [vmem:[#allocation7 + $0x78] sm:$0xff] }
  0x77   :  { %v286_v40 = vld [vmem:[#allocation2] sm:$0xff]  ;;  %v464_v42 = vld [vmem:[#allocation10 + $0x8] sm:$0xff]  ;;  %v465_v43 = vld [vmem:[#allocation10 + $0x10] sm:$0xff] }
  0x78   :  { %2384 = vmatpush3.bf16.msra.mxu0 %v2381_v8  ;;  %2013 = vmatprep.mubr.f32.mxu1 %v286_v40  ;;  %v463_v41 = vld [vmem:[#allocation10] sm:$0xff]  ;;  %v466_v45 = vld [vmem:[#allocation10 + $0x18] sm:$0xff]  ;;  %v468_v48 = vld [vmem:[#allocation10 + $0x28] sm:$0xff] }
  0x79   :  { %2386 = vmatprep.subr.bf16.mxu0 %v2385_v12  ;;  %v2437_v44 = vpack.c.bf16 %v464_v42, %v463_v41  ;;  %v2441_v46 = vpack.c.bf16 %v466_v45, %v465_v43  ;;  %v467_v47 = vld [vmem:[#allocation10 + $0x20] sm:$0xff]  ;;  %v469_v50 = vld [vmem:[#allocation10 + $0x30] sm:$0xff]  ;;  %v470_v51 = vld [vmem:[#allocation10 + $0x38] sm:$0xff] }
  0x7a   :  { %v2445_v49 = vpack.c.bf16 %v468_v48, %v467_v47  ;;  %v2449_v52 = vpack.c.bf16 %v470_v51, %v469_v50  ;;  %v471_v53 = vld [vmem:[#allocation10 + $0x40] sm:$0xff]  ;;  %v472_v54 = vld [vmem:[#allocation10 + $0x48] sm:$0xff]  ;;  %v473_v56 = vld [vmem:[#allocation10 + $0x50] sm:$0xff] }
  0x7b   :  { %v2453_v55 = vpack.c.bf16 %v472_v54, %v471_v53  ;;  %v474_v57 = vld [vmem:[#allocation10 + $0x58] sm:$0xff]  ;;  %v475_v59 = vld [vmem:[#allocation10 + $0x60] sm:$0xff]  ;;  %v476_v60 = vld [vmem:[#allocation10 + $0x68] sm:$0xff] }
  0x7c   :  { %2388 = vmatpush3.bf16.msra.mxu0 %v2385_v12  ;;  %v2457_v58 = vpack.c.bf16 %v474_v57, %v473_v56  ;;  %v2461_v61 = vpack.c.bf16 %v476_v60, %v475_v59  ;;  %v287_v22 = vld [vmem:[#allocation2 + $0x8] sm:$0xff]  ;;  %v288_v23 = vld [vmem:[#allocation2 + $0x10] sm:$0xff] }
  0x7d   :  { %2390 = vmatprep.subr.bf16.mxu0 %v2389_v15 }
  0x80   :  { %2392 = vmatpush3.bf16.msra.mxu0 %v2389_v15 }
  0x81   :  { %2394 = vmatprep.subr.bf16.mxu0 %v2393_v18 }
  0x84   :  { %2396 = vmatpush3.bf16.msra.mxu0 %v2393_v18 }
  0x85   :  { %2398 = vmatprep.subr.bf16.mxu0 %v2397_v21 }
  0x88   :  { %2400 = vmatpush3.bf16.msra.mxu0 %v2397_v21 }
  0x89   :  { %2402 = vmatprep.subr.bf16.mxu0 %v2401_v24 }
  0x8c   :  { %2404 = vmatpush3.bf16.msra.mxu0 %v2401_v24  ;;  %v289_v24 = vld [vmem:[#allocation2 + $0x18] sm:$0xff] }
  0x8d   :  { %2438 = vmatprep.subr.bf16.mxu0 %v2437_v44 }
  0x8f   :  { %1958 = vmatmul.mubr.f32.vlgmr.msra.gmra.mrb[0].mxu0 %v110_v25  ;;  %v290_v25 = vld [vmem:[#allocation2 + $0x20] sm:$0xff] }
  0x90   :  { %1960 = vmatprep.mubr.f32.mxu0 %v111_v26  ;;  %2440 = vmatpush3.bf16.msra.mxu0 %v2437_v44  ;;  %v291_v26 = vld [vmem:[#allocation2 + $0x28] sm:$0xff] }
  0x91   :  { %2442 = vmatprep.subr.bf16.mxu0 %v2441_v46 }
  0x93   :  { %1961 = vmatmul.mubr.f32.gmra.mrb[2].mxu0 %v112_v27  ;;  %v292_v27 = vld [vmem:[#allocation2 + $0x30] sm:$0xff] }
  0x94   :  { %1963 = vmatprep.mubr.f32.mxu0 %v113_v28  ;;  %2444 = vmatpush3.bf16.msra.mxu0 %v2441_v46  ;;  %v293_v28 = vld [vmem:[#allocation2 + $0x38] sm:$0xff] }
  0x95   :  { %2446 = vmatprep.subr.bf16.mxu0 %v2445_v49 }
  0x97   :  { %1964 = vmatmul.mubr.f32.gmra.mrb[4].mxu0 %v114_v29  ;;  %v294_v29 = vld [vmem:[#allocation2 + $0x40] sm:$0xff] }
  0x98   :  { %1966 = vmatprep.mubr.f32.mxu0 %v115_v30  ;;  %2448 = vmatpush3.bf16.msra.mxu0 %v2445_v49  ;;  %v295_v30 = vld [vmem:[#allocation2 + $0x48] sm:$0xff] }
  0x99   :  { %2450 = vmatprep.subr.bf16.mxu0 %v2449_v52 }
  0x9b   :  { %1967 = vmatmul.mubr.f32.gmra.mrb[6].mxu0 %v116_v31  ;;  %v296_v31 = vld [vmem:[#allocation2 + $0x50] sm:$0xff] }
  0x9c   :  { %1969 = vmatprep.mubr.f32.mxu0 %v117_v32  ;;  %2452 = vmatpush3.bf16.msra.mxu0 %v2449_v52  ;;  %v297_v32 = vld [vmem:[#allocation2 + $0x58] sm:$0xff] }
  0x9d   :  { %2454 = vmatprep.subr.bf16.mxu0 %v2453_v55 }
  0x9f   :  { %1970 = vmatmul.mubr.f32.gmra.mrb[8].mxu0 %v118_v33  ;;  %v298_v33 = vld [vmem:[#allocation2 + $0x60] sm:$0xff] }
  0xa0   :  { %1972 = vmatprep.mubr.f32.mxu0 %v119_v34  ;;  %2456 = vmatpush3.bf16.msra.mxu0 %v2453_v55  ;;  %v299_v34 = vld [vmem:[#allocation2 + $0x68] sm:$0xff] }
  0xa1   :  { %2458 = vmatprep.subr.bf16.mxu0 %v2457_v58 }
  0xa3   :  { %1973 = vmatmul.mubr.f32.gmra.mrb[10].mxu0 %v120_v35  ;;  %v300_v35 = vld [vmem:[#allocation2 + $0x70] sm:$0xff] }
  0xa4   :  { %1975 = vmatprep.mubr.f32.mxu0 %v121_v36  ;;  %2460 = vmatpush3.bf16.msra.mxu0 %v2457_v58  ;;  %v301_v36 = vld [vmem:[#allocation2 + $0x78] sm:$0xff] }
  0xa5   :  { %2462 = vmatprep.subr.bf16.mxu0 %v2461_v61 }
  0xa7   :  { %1976 = vmatmul.mubr.f32.gmra.mrb[12].mxu0 %v122_v37  ;;  %v477_v37 = vld [vmem:[#allocation10 + $0x70] sm:$0xff] }
  0xa8   :  { %1978 = vmatprep.mubr.f32.mxu0 %v123_v38  ;;  %2464 = vmatpush3.bf16.msra.mxu0 %v2461_v61  ;;  %v478_v38 = vld [vmem:[#allocation10 + $0x78] sm:$0xff] }
  0xab   :  { %1979 = vmatmul.mubr.f32.gmra.mrb[14].mxu0 %v124_v39  ;;  %v2465_v39 = vpack.c.bf16 %v478_v38, %v477_v37 }
  0xad   :  { %2466 = vmatprep.subr.bf16.mxu0 %v2465_v39 }
  0xae   :  { %2468 = vmatpush3.bf16.msra.mxu0 %v2465_v39 }
 0x162   :  { %v1959_v62 = vpop.f32.mrb[0].mxu0 }
 0x163   :  { %v207_v63 = vpop.f32.mrb[1].mxu0 }
 0x164   :  { %v2405_v0 = vpack.c.bf16 %v1959_v62, %v207_v63 }
 0x166   :  { %v1962_v1 = vpop.f32.mrb[2].mxu0  ;;  %2406 = vmatprep.subr.bf16.mxu1 %v2405_v0 }
 0x167   :  { %v217_v2 = vpop.f32.mrb[3].mxu0  ;;  %2408 = vmatpush3.bf16.msra.mxu1 %v2405_v0 }
 0x168   :  { %v2409_v3 = vpack.c.bf16 %v1962_v1, %v217_v2 }
 0x16a   :  { %v1965_v4 = vpop.f32.mrb[4].mxu0  ;;  %2410 = vmatprep.subr.bf16.mxu1 %v2409_v3 }
 0x16b   :  { %v227_v5 = vpop.f32.mrb[5].mxu0  ;;  %2412 = vmatpush3.bf16.msra.mxu1 %v2409_v3 }
 0x16c   :  { %v2413_v6 = vpack.c.bf16 %v1965_v4, %v227_v5 }
 0x16e   :  { %v1968_v7 = vpop.f32.mrb[6].mxu0  ;;  %2414 = vmatprep.subr.bf16.mxu1 %v2413_v6 }
 0x16f   :  { %v237_v8 = vpop.f32.mrb[7].mxu0  ;;  %2416 = vmatpush3.bf16.msra.mxu1 %v2413_v6 }
 0x170   :  { %v2417_v9 = vpack.c.bf16 %v1968_v7, %v237_v8  ;;  %v3026_v8 = vld [vmem:[#allocation5] sm:$0xff] }
 0x172   :  { %v1971_v10 = vpop.f32.mrb[8].mxu0  ;;  %2418 = vmatprep.subr.bf16.mxu1 %v2417_v9 }
 0x173   :  { %v247_v11 = vpop.f32.mrb[9].mxu0  ;;  %2420 = vmatpush3.bf16.msra.mxu1 %v2417_v9  ;;  %v802_v9 = vld [vmem:[#allocation10 + $0x80] sm:$0xff] }
 0x174   :  { %v2421_v12 = vpack.c.bf16 %v1971_v10, %v247_v11  ;;  %v803_v10 = vld [vmem:[#allocation10 + $0x88] sm:$0xff]  ;;  %v804_v11 = vld [vmem:[#allocation10 + $0x90] sm:$0xff] }
 0x176   :  { %v1974_v13 = vpop.f32.mrb[10].mxu0  ;;  %2422 = vmatprep.subr.bf16.mxu1 %v2421_v12 }
 0x177   :  { %v257_v14 = vpop.f32.mrb[11].mxu0  ;;  %2424 = vmatpush3.bf16.msra.mxu1 %v2421_v12  ;;  %v2501_v12 = vpack.c.bf16 %v803_v10, %v802_v9 }
 0x178   :  { %v2425_v15 = vpack.c.bf16 %v1974_v13, %v257_v14  ;;  %v805_v13 = vld [vmem:[#allocation10 + $0x98] sm:$0xff] }
 0x179   :  { %v2505_v14 = vpack.c.bf16 %v805_v13, %v804_v11  ;;  %2502 = vmatprep.subr.bf16.mxu0 %v2501_v12 }
 0x17a   :  { %v1977_v16 = vpop.f32.mrb[12].mxu0  ;;  %2426 = vmatprep.subr.bf16.mxu1 %v2425_v15 }
 0x17b   :  { %v267_v17 = vpop.f32.mrb[13].mxu0  ;;  %2428 = vmatpush3.bf16.msra.mxu1 %v2425_v15  ;;  %v806_v15 = vld [vmem:[#allocation10 + $0xa0] sm:$0xff] }
 0x17c   :  { %v2429_v18 = vpack.c.bf16 %v1977_v16, %v267_v17  ;;  %v807_v16 = vld [vmem:[#allocation10 + $0xa8] sm:$0xff] }
 0x17d   :  { %v2509_v17 = vpack.c.bf16 %v807_v16, %v806_v15 }
 0x17e   :  { %v1980_v19 = vpop.f32.mrb[14].mxu0  ;;  %2430 = vmatprep.subr.bf16.mxu1 %v2429_v18 }
 0x17f   :  { %v277_v20 = vpop.f32.mrb[15].mxu0  ;;  %2432 = vmatpush3.bf16.msra.mxu1 %v2429_v18  ;;  %v808_v18 = vld [vmem:[#allocation10 + $0xb0] sm:$0xff] }
 0x180   :  { %v2433_v21 = vpack.c.bf16 %v1980_v19, %v277_v20  ;;  %v809_v19 = vld [vmem:[#allocation10 + $0xb8] sm:$0xff] }
 0x181   :  { %v2513_v20 = vpack.c.bf16 %v809_v19, %v808_v18 }
 0x182   :  { %2434 = vmatprep.subr.bf16.mxu1 %v2433_v21 }
 0x183   :  { %2436 = vmatpush3.bf16.msra.mxu1 %v2433_v21  ;;  %v810_v21 = vld [vmem:[#allocation10 + $0xc0] sm:$0xff] }
 0x186   :  { %2014 = vmatmul.mubr.f32.vlgmr.msra.gmra.mrb[0].mxu1 %v287_v22  ;;  %v811_v22 = vld [vmem:[#allocation10 + $0xc8] sm:$0xff] }
 0x187   :  { %2016 = vmatprep.mubr.f32.mxu1 %v288_v23  ;;  %v2517_v23 = vpack.c.bf16 %v811_v22, %v810_v21 }
 0x18a   :  { %2017 = vmatmul.mubr.f32.gmra.mrb[2].mxu1 %v289_v24  ;;  %v812_v24 = vld [vmem:[#allocation10 + $0xd0] sm:$0xff] }
 0x18b   :  { %2019 = vmatprep.mubr.f32.mxu1 %v290_v25  ;;  %v813_v25 = vld [vmem:[#allocation10 + $0xd8] sm:$0xff] }
 0x18e   :  { %2020 = vmatmul.mubr.f32.gmra.mrb[4].mxu1 %v291_v26  ;;  %v2521_v26 = vpack.c.bf16 %v813_v25, %v812_v24 }
 0x18f   :  { %2022 = vmatprep.mubr.f32.mxu1 %v292_v27  ;;  %v814_v27 = vld [vmem:[#allocation10 + $0xe0] sm:$0xff] }
 0x192   :  { %2023 = vmatmul.mubr.f32.gmra.mrb[6].mxu1 %v293_v28  ;;  %v815_v28 = vld [vmem:[#allocation10 + $0xe8] sm:$0xff] }
 0x193   :  { %2025 = vmatprep.mubr.f32.mxu1 %v294_v29  ;;  %v2525_v29 = vpack.c.bf16 %v815_v28, %v814_v27 }
 0x196   :  { %2026 = vmatmul.mubr.f32.gmra.mrb[8].mxu1 %v295_v30 }
 0x197   :  { %2028 = vmatprep.mubr.f32.mxu1 %v296_v31 }
 0x19a   :  { %2029 = vmatmul.mubr.f32.gmra.mrb[10].mxu1 %v297_v32 }
 0x19b   :  { %2031 = vmatprep.mubr.f32.mxu1 %v298_v33 }
 0x19e   :  { %2032 = vmatmul.mubr.f32.gmra.mrb[12].mxu1 %v299_v34 }
 0x19f   :  { %2034 = vmatprep.mubr.f32.mxu1 %v300_v35 }
 0x1a2   :  { %2035 = vmatmul.mubr.f32.gmra.mrb[14].mxu1 %v301_v36 }
 0x1a3   :  { %2125 = vmatprep.mubr.f32.mxu1 %v3026_v8 }
 0x259   :  { %v2015_v40 = vpop.f32.mrb[0].mxu1 }
 0x25a   :  { %v368_v41 = vpop.f32.mrb[1].mxu1  ;;  %v448_v43 = vmax.f32 %v2015_v40, 0.0 }
 0x25b   :  { %v447_v42 = vmax.f32 %v368_v41, 0.0 }
 0x25d   :  { %v2018_v44 = vpop.f32.mrb[2].mxu1  ;;  %2069 = vmatprep.mubr.f32.mxu0 %v447_v42 }
 0x25e   :  { %v378_v45 = vpop.f32.mrb[3].mxu1  ;;  %2070 = vmatmul.mubr.f32.vlgmr.msra.gmra.mrb[16].mxu0 %v448_v43  ;;  %v450_v47 = vmax.f32 %v2018_v44, 0.0 }
 0x25f   :  { %v449_v46 = vmax.f32 %v378_v45, 0.0  ;;  %2504 = vmatpush3.bf16.msra.mxu0 %v2501_v12 }
 0x260   :  { %2506 = vmatprep.subr.bf16.mxu0 %v2505_v14 }
 0x261   :  { %v2021_v48 = vpop.f32.mrb[4].mxu1  ;;  %2072 = vmatprep.mubr.f32.mxu0 %v449_v46 }
 0x262   :  { %v388_v49 = vpop.f32.mrb[5].mxu1  ;;  %2073 = vmatmul.mubr.f32.gmra.mrb[18].mxu0 %v450_v47  ;;  %v452_v51 = vmax.f32 %v2021_v48, 0.0 }
 0x263   :  { %v451_v50 = vmax.f32 %v388_v49, 0.0  ;;  %2508 = vmatpush3.bf16.msra.mxu0 %v2505_v14 }
 0x264   :  { %2510 = vmatprep.subr.bf16.mxu0 %v2509_v17 }
 0x265   :  { %v2024_v52 = vpop.f32.mrb[6].mxu1  ;;  %2075 = vmatprep.mubr.f32.mxu0 %v451_v50 }
 0x266   :  { %v398_v53 = vpop.f32.mrb[7].mxu1  ;;  %2076 = vmatmul.mubr.f32.gmra.mrb[20].mxu0 %v452_v51  ;;  %v454_v55 = vmax.f32 %v2024_v52, 0.0 }
 0x267   :  { %v453_v54 = vmax.f32 %v398_v53, 0.0  ;;  %2512 = vmatpush3.bf16.msra.mxu0 %v2509_v17 }
 0x268   :  { %2514 = vmatprep.subr.bf16.mxu0 %v2513_v20 }
 0x269   :  { %v2027_v56 = vpop.f32.mrb[8].mxu1  ;;  %2078 = vmatprep.mubr.f32.mxu0 %v453_v54  ;;  %v3029_v54 = vld [vmem:[#allocation5 + $0x8] sm:$0xff] }
 0x26a   :  { %v408_v57 = vpop.f32.mrb[9].mxu1  ;;  %2079 = vmatmul.mubr.f32.gmra.mrb[22].mxu0 %v454_v55  ;;  %v456_v59 = vmax.f32 %v2027_v56, 0.0  ;;  %v3031_v55 = vld [vmem:[#allocation5 + $0x10] sm:$0xff]  ;;  %v3035_v56 = vld [vmem:[#allocation5 + $0x18] sm:$0xff] }
 0x26b   :  { %v455_v58 = vmax.f32 %v408_v57, 0.0  ;;  %2516 = vmatpush3.bf16.msra.mxu0 %v2513_v20  ;;  %v3037_v57 = vld [vmem:[#allocation5 + $0x20] sm:$0xff] }
 0x26c   :  { %2518 = vmatprep.subr.bf16.mxu0 %v2517_v23 }
 0x26d   :  { %v2030_v60 = vpop.f32.mrb[10].mxu1  ;;  %2081 = vmatprep.mubr.f32.mxu0 %v455_v58  ;;  %v3041_v58 = vld [vmem:[#allocation5 + $0x28] sm:$0xff] }
 0x26e   :  { %v418_v61 = vpop.f32.mrb[11].mxu1  ;;  %2082 = vmatmul.mubr.f32.gmra.mrb[24].mxu0 %v456_v59  ;;  %v458_v63 = vmax.f32 %v2030_v60, 0.0  ;;  %v3043_v59 = vld [vmem:[#allocation5 + $0x30] sm:$0xff]  ;;  %v3047_v60 = vld [vmem:[#allocation5 + $0x38] sm:$0xff] }
 0x26f   :  { %v457_v62 = vmax.f32 %v418_v61, 0.0  ;;  %2520 = vmatpush3.bf16.msra.mxu0 %v2517_v23  ;;  %v3049_v61 = vld [vmem:[#allocation5 + $0x40] sm:$0xff] }
 0x270   :  { %2522 = vmatprep.subr.bf16.mxu0 %v2521_v26 }
 0x271   :  { %v2033_v0 = vpop.f32.mrb[12].mxu1  ;;  %2084 = vmatprep.mubr.f32.mxu0 %v457_v62  ;;  %v3053_v62 = vld [vmem:[#allocation5 + $0x48] sm:$0xff] }
 0x272   :  { %v428_v1 = vpop.f32.mrb[13].mxu1  ;;  %2085 = vmatmul.mubr.f32.gmra.mrb[26].mxu0 %v458_v63  ;;  %v460_v3 = vmax.f32 %v2033_v0, 0.0  ;;  %v3055_v63 = vld [vmem:[#allocation5 + $0x50] sm:$0xff]  ;;  %v3059_v0 = vld [vmem:[#allocation5 + $0x58] sm:$0xff] }
 0x273   :  { %v459_v2 = vmax.f32 %v428_v1, 0.0  ;;  %2524 = vmatpush3.bf16.msra.mxu0 %v2521_v26  ;;  %v3061_v1 = vld [vmem:[#allocation5 + $0x60] sm:$0xff] }
 0x274   :  { %2526 = vmatprep.subr.bf16.mxu0 %v2525_v29 }
 0x275   :  { %v2036_v4 = vpop.f32.mrb[14].mxu1  ;;  %2087 = vmatprep.mubr.f32.mxu0 %v459_v2  ;;  %v3065_v2 = vld [vmem:[#allocation5 + $0x68] sm:$0xff] }
 0x276   :  { %v438_v5 = vpop.f32.mrb[15].mxu1  ;;  %2088 = vmatmul.mubr.f32.gmra.mrb[28].mxu0 %v460_v3  ;;  %v462_v7 = vmax.f32 %v2036_v4, 0.0  ;;  %v3067_v3 = vld [vmem:[#allocation5 + $0x70] sm:$0xff]  ;;  %v3071_v4 = vld [vmem:[#allocation5 + $0x78] sm:$0xff] }
 0x277   :  { %v461_v6 = vmax.f32 %v438_v5, 0.0  ;;  %2528 = vmatpush3.bf16.msra.mxu0 %v2525_v29  ;;  %v816_v5 = vld [vmem:[#allocation10 + $0xf0] sm:$0xff] }
 0x279   :  { %2090 = vmatprep.mubr.f32.mxu0 %v461_v6  ;;  %v817_v6 = vld [vmem:[#allocation10 + $0xf8] sm:$0xff] }
 0x27a   :  { %2091 = vmatmul.mubr.f32.gmra.mrb[30].mxu0 %v462_v7  ;;  %v2529_v7 = vpack.c.bf16 %v817_v6, %v816_v5  ;;  %v1133_v5 = vld [vmem:[#allocation11 + $0x48] sm:$0xff] }
 0x27c   :  { %2530 = vmatprep.subr.bf16.mxu0 %v2529_v7 }
 0x27d   :  { %2532 = vmatpush3.bf16.msra.mxu0 %v2529_v7  ;;  %v1134_v7 = vld [vmem:[#allocation11 + $0x50] sm:$0xff] }
 0x331   :  { %v2071_v30 = vpop.f32.mrb[16].mxu0 }
 0x332   :  { %v545_v31 = vpop.f32.mrb[17].mxu0 }
 0x333   :  { %v2469_v32 = vpack.c.bf16 %v2071_v30, %v545_v31 }
 0x335   :  { %v2074_v33 = vpop.f32.mrb[18].mxu0  ;;  %2470 = vmatprep.subr.bf16.mxu1 %v2469_v32 }
 0x336   :  { %v555_v34 = vpop.f32.mrb[19].mxu0  ;;  %2472 = vmatpush3.bf16.msra.mxu1 %v2469_v32 }
 0x337   :  { %v2473_v35 = vpack.c.bf16 %v2074_v33, %v555_v34 }
 0x339   :  { %v2077_v36 = vpop.f32.mrb[20].mxu0  ;;  %2474 = vmatprep.subr.bf16.mxu1 %v2473_v35 }
 0x33a   :  { %v565_v37 = vpop.f32.mrb[21].mxu0  ;;  %2476 = vmatpush3.bf16.msra.mxu1 %v2473_v35 }
 0x33b   :  { %v2477_v38 = vpack.c.bf16 %v2077_v36, %v565_v37 }
 0x33d   :  { %v2080_v39 = vpop.f32.mrb[22].mxu0  ;;  %2478 = vmatprep.subr.bf16.mxu1 %v2477_v38 }
 0x33e   :  { %v575_v40 = vpop.f32.mrb[23].mxu0  ;;  %2480 = vmatpush3.bf16.msra.mxu1 %v2477_v38 }
 0x33f   :  { %v2481_v41 = vpack.c.bf16 %v2080_v39, %v575_v40 }
 0x341   :  { %v2083_v42 = vpop.f32.mrb[24].mxu0  ;;  %2482 = vmatprep.subr.bf16.mxu1 %v2481_v41 }
 0x342   :  { %v585_v43 = vpop.f32.mrb[25].mxu0  ;;  %2484 = vmatpush3.bf16.msra.mxu1 %v2481_v41  ;;  %v1124_v41 = vld [vmem:[#allocation11] sm:$0xff] }
 0x343   :  { %v2485_v44 = vpack.c.bf16 %v2083_v42, %v585_v43  ;;  %v1125_v42 = vld [vmem:[#allocation11 + $0x8] sm:$0xff]  ;;  %v1126_v43 = vld [vmem:[#allocation11 + $0x10] sm:$0xff] }
 0x345   :  { %v2086_v45 = vpop.f32.mrb[26].mxu0  ;;  %2486 = vmatprep.subr.bf16.mxu1 %v2485_v44 }
 0x346   :  { %v595_v46 = vpop.f32.mrb[27].mxu0  ;;  %2488 = vmatpush3.bf16.msra.mxu1 %v2485_v44  ;;  %v2565_v44 = vpack.c.bf16 %v1125_v42, %v1124_v41 }
 0x347   :  { %v2489_v47 = vpack.c.bf16 %v2086_v45, %v595_v46  ;;  %v1127_v45 = vld [vmem:[#allocation11 + $0x18] sm:$0xff] }
 0x348   :  { %v2569_v46 = vpack.c.bf16 %v1127_v45, %v1126_v43  ;;  %2566 = vmatprep.subr.bf16.mxu0 %v2565_v44 }
 0x349   :  { %v2089_v48 = vpop.f32.mrb[28].mxu0  ;;  %2490 = vmatprep.subr.bf16.mxu1 %v2489_v47 }
 0x34a   :  { %v605_v49 = vpop.f32.mrb[29].mxu0  ;;  %2492 = vmatpush3.bf16.msra.mxu1 %v2489_v47  ;;  %v1128_v47 = vld [vmem:[#allocation11 + $0x20] sm:$0xff] }
 0x34b   :  { %v2493_v50 = vpack.c.bf16 %v2089_v48, %v605_v49  ;;  %v1129_v48 = vld [vmem:[#allocation11 + $0x28] sm:$0xff] }
 0x34c   :  { %v2573_v49 = vpack.c.bf16 %v1129_v48, %v1128_v47 }
 0x34d   :  { %v2092_v51 = vpop.f32.mrb[30].mxu0  ;;  %2494 = vmatprep.subr.bf16.mxu1 %v2493_v50 }
 0x34e   :  { %v615_v52 = vpop.f32.mrb[31].mxu0  ;;  %2496 = vmatpush3.bf16.msra.mxu1 %v2493_v50  ;;  %v1130_v50 = vld [vmem:[#allocation11 + $0x30] sm:$0xff] }
 0x34f   :  { %v2497_v53 = vpack.c.bf16 %v2092_v51, %v615_v52  ;;  %v1131_v51 = vld [vmem:[#allocation11 + $0x38] sm:$0xff] }
 0x350   :  { %v2577_v52 = vpack.c.bf16 %v1131_v51, %v1130_v50 }
 0x351   :  { %2498 = vmatprep.subr.bf16.mxu1 %v2497_v53 }
 0x352   :  { %2500 = vmatpush3.bf16.msra.mxu1 %v2497_v53  ;;  %v1132_v53 = vld [vmem:[#allocation11 + $0x40] sm:$0xff] }
 0x353   :  { %v2581_v6 = vpack.c.bf16 %v1133_v5, %v1132_v53 }
 0x355   :  { %2126 = vmatmul.mubr.f32.vlgmr.msra.gmra.mrb[16].mxu1 %v3029_v54 }
 0x356   :  { %2128 = vmatprep.mubr.f32.mxu1 %v3031_v55 }
 0x359   :  { %2129 = vmatmul.mubr.f32.gmra.mrb[18].mxu1 %v3035_v56 }
 0x35a   :  { %2131 = vmatprep.mubr.f32.mxu1 %v3037_v57 }
 0x35d   :  { %2132 = vmatmul.mubr.f32.gmra.mrb[20].mxu1 %v3041_v58 }
 0x35e   :  { %2134 = vmatprep.mubr.f32.mxu1 %v3043_v59 }
 0x361   :  { %2135 = vmatmul.mubr.f32.gmra.mrb[22].mxu1 %v3047_v60 }
 0x362   :  { %2137 = vmatprep.mubr.f32.mxu1 %v3049_v61 }
 0x365   :  { %2138 = vmatmul.mubr.f32.gmra.mrb[24].mxu1 %v3053_v62 }
 0x366   :  { %2140 = vmatprep.mubr.f32.mxu1 %v3055_v63 }
 0x369   :  { %2141 = vmatmul.mubr.f32.gmra.mrb[26].mxu1 %v3059_v0 }
 0x36a   :  { %2143 = vmatprep.mubr.f32.mxu1 %v3061_v1 }
 0x36d   :  { %2144 = vmatmul.mubr.f32.gmra.mrb[28].mxu1 %v3065_v2 }
 0x36e   :  { %2146 = vmatprep.mubr.f32.mxu1 %v3067_v3 }
 0x371   :  { %2147 = vmatmul.mubr.f32.gmra.mrb[30].mxu1 %v3071_v4 }
 0x372   :  { %2237 = vmatprep.mubr.f32.mxu1 %v3026_v8 }
 0x428   :  { %v2127_v9 = vpop.f32.mrb[16].mxu1 }
 0x429   :  { %v706_v10 = vpop.f32.mrb[17].mxu1  ;;  %v786_v12 = vmax.f32 %v2127_v9, 0.0  ;;  %v1135_v9 = vld [vmem:[#allocation11 + $0x58] sm:$0xff] }
 0x42a   :  { %v785_v11 = vmax.f32 %v706_v10, 0.0  ;;  %v2585_v10 = vpack.c.bf16 %v1135_v9, %v1134_v7 }
 0x42c   :  { %v2130_v13 = vpop.f32.mrb[18].mxu1  ;;  %2181 = vmatprep.mubr.f32.mxu0 %v785_v11  ;;  %v1136_v11 = vld [vmem:[#allocation11 + $0x60] sm:$0xff] }
 0x42d   :  { %v716_v14 = vpop.f32.mrb[19].mxu1  ;;  %2182 = vmatmul.mubr.f32.vlgmr.msra.gmra.mrb[32].mxu0 %v786_v12  ;;  %v788_v16 = vmax.f32 %v2130_v13, 0.0  ;;  %v1137_v12 = vld [vmem:[#allocation11 + $0x68] sm:$0xff] }
 0x42e   :  { %v787_v15 = vmax.f32 %v716_v14, 0.0  ;;  %2568 = vmatpush3.bf16.msra.mxu0 %v2565_v44  ;;  %v2589_v13 = vpack.c.bf16 %v1137_v12, %v1136_v11 }
 0x42f   :  { %2570 = vmatprep.subr.bf16.mxu0 %v2569_v46 }
 0x430   :  { %v2133_v17 = vpop.f32.mrb[20].mxu1  ;;  %2184 = vmatprep.mubr.f32.mxu0 %v787_v15 }
 0x431   :  { %v726_v18 = vpop.f32.mrb[21].mxu1  ;;  %2185 = vmatmul.mubr.f32.gmra.mrb[34].mxu0 %v788_v16  ;;  %v790_v20 = vmax.f32 %v2133_v17, 0.0 }
 0x432   :  { %v789_v19 = vmax.f32 %v726_v18, 0.0  ;;  %2572 = vmatpush3.bf16.msra.mxu0 %v2569_v46 }
 0x433   :  { %2574 = vmatprep.subr.bf16.mxu0 %v2573_v49 }
 0x434   :  { %v2136_v21 = vpop.f32.mrb[22].mxu1  ;;  %2187 = vmatprep.mubr.f32.mxu0 %v789_v19 }
 0x435   :  { %v736_v22 = vpop.f32.mrb[23].mxu1  ;;  %2188 = vmatmul.mubr.f32.gmra.mrb[36].mxu0 %v790_v20  ;;  %v792_v24 = vmax.f32 %v2136_v21, 0.0 }
 0x436   :  { %v791_v23 = vmax.f32 %v736_v22, 0.0  ;;  %2576 = vmatpush3.bf16.msra.mxu0 %v2573_v49 }
 0x437   :  { %2578 = vmatprep.subr.bf16.mxu0 %v2577_v52 }
 0x438   :  { %v2139_v25 = vpop.f32.mrb[24].mxu1  ;;  %2190 = vmatprep.mubr.f32.mxu0 %v791_v23 }
 0x439   :  { %v746_v26 = vpop.f32.mrb[25].mxu1  ;;  %2191 = vmatmul.mubr.f32.gmra.mrb[38].mxu0 %v792_v24  ;;  %v794_v28 = vmax.f32 %v2139_v25, 0.0 }
 0x43a   :  { %v793_v27 = vmax.f32 %v746_v26, 0.0  ;;  %2580 = vmatpush3.bf16.msra.mxu0 %v2577_v52 }
 0x43b   :  { %2582 = vmatprep.subr.bf16.mxu0 %v2581_v6 }
 0x43c   :  { %v2142_v29 = vpop.f32.mrb[26].mxu1  ;;  %2193 = vmatprep.mubr.f32.mxu0 %v793_v27 }
 0x43d   :  { %v756_v30 = vpop.f32.mrb[27].mxu1  ;;  %2194 = vmatmul.mubr.f32.gmra.mrb[40].mxu0 %v794_v28  ;;  %v796_v32 = vmax.f32 %v2142_v29, 0.0 }
 0x43e   :  { %v795_v31 = vmax.f32 %v756_v30, 0.0  ;;  %2584 = vmatpush3.bf16.msra.mxu0 %v2581_v6 }
 0x43f   :  { %2586 = vmatprep.subr.bf16.mxu0 %v2585_v10 }
 0x440   :  { %v2145_v33 = vpop.f32.mrb[28].mxu1  ;;  %2196 = vmatprep.mubr.f32.mxu0 %v795_v31 }
 0x441   :  { %v766_v34 = vpop.f32.mrb[29].mxu1  ;;  %2197 = vmatmul.mubr.f32.gmra.mrb[42].mxu0 %v796_v32  ;;  %v798_v36 = vmax.f32 %v2145_v33, 0.0 }
 0x442   :  { %v797_v35 = vmax.f32 %v766_v34, 0.0  ;;  %2588 = vmatpush3.bf16.msra.mxu0 %v2585_v10 }
 0x443   :  { %2590 = vmatprep.subr.bf16.mxu0 %v2589_v13 }
 0x444   :  { %v2148_v37 = vpop.f32.mrb[30].mxu1  ;;  %2199 = vmatprep.mubr.f32.mxu0 %v797_v35 }
 0x445   :  { %v776_v38 = vpop.f32.mrb[31].mxu1  ;;  %2200 = vmatmul.mubr.f32.gmra.mrb[44].mxu0 %v798_v36  ;;  %v800_v40 = vmax.f32 %v2148_v37, 0.0 }
 0x446   :  { %v799_v39 = vmax.f32 %v776_v38, 0.0  ;;  %2592 = vmatpush3.bf16.msra.mxu0 %v2589_v13  ;;  %v1138_v38 = vld [vmem:[#allocation11 + $0x70] sm:$0xff] }
 0x448   :  { %2202 = vmatprep.mubr.f32.mxu0 %v799_v39  ;;  %v1139_v39 = vld [vmem:[#allocation11 + $0x78] sm:$0xff] }
 0x449   :  { %2203 = vmatmul.mubr.f32.gmra.mrb[46].mxu0 %v800_v40  ;;  %v2593_v40 = vpack.c.bf16 %v1139_v39, %v1138_v38 }
 0x44b   :  { %2594 = vmatprep.subr.bf16.mxu0 %v2593_v40 }
 0x44c   :  { %2596 = vmatpush3.bf16.msra.mxu0 %v2593_v40 }
 0x500   :  { %v2183_v14 = vpop.f32.mrb[32].mxu0 }
 0x501   :  { %v884_v15 = vpop.f32.mrb[33].mxu0 }
 0x502   :  { %v2533_v16 = vpack.c.bf16 %v2183_v14, %v884_v15 }
 0x504   :  { %v2186_v17 = vpop.f32.mrb[34].mxu0  ;;  %2534 = vmatprep.subr.bf16.mxu1 %v2533_v16 }
 0x505   :  { %v894_v18 = vpop.f32.mrb[35].mxu0  ;;  %2536 = vmatpush3.bf16.msra.mxu1 %v2533_v16 }
 0x506   :  { %v2537_v19 = vpack.c.bf16 %v2186_v17, %v894_v18 }
 0x508   :  { %v2189_v20 = vpop.f32.mrb[36].mxu0  ;;  %2538 = vmatprep.subr.bf16.mxu1 %v2537_v19 }
 0x509   :  { %v904_v21 = vpop.f32.mrb[37].mxu0  ;;  %2540 = vmatpush3.bf16.msra.mxu1 %v2537_v19 }
 0x50a   :  { %v2541_v22 = vpack.c.bf16 %v2189_v20, %v904_v21 }
 0x50c   :  { %v2192_v23 = vpop.f32.mrb[38].mxu0  ;;  %2542 = vmatprep.subr.bf16.mxu1 %v2541_v22 }
 0x50d   :  { %v914_v24 = vpop.f32.mrb[39].mxu0  ;;  %2544 = vmatpush3.bf16.msra.mxu1 %v2541_v22 }
 0x50e   :  { %v2545_v25 = vpack.c.bf16 %v2192_v23, %v914_v24 }
 0x510   :  { %v2195_v26 = vpop.f32.mrb[40].mxu0  ;;  %2546 = vmatprep.subr.bf16.mxu1 %v2545_v25 }
 0x511   :  { %v924_v27 = vpop.f32.mrb[41].mxu0  ;;  %2548 = vmatpush3.bf16.msra.mxu1 %v2545_v25 }
 0x512   :  { %v2549_v28 = vpack.c.bf16 %v2195_v26, %v924_v27 }
 0x514   :  { %v2198_v29 = vpop.f32.mrb[42].mxu0  ;;  %2550 = vmatprep.subr.bf16.mxu1 %v2549_v28 }
 0x515   :  { %v934_v30 = vpop.f32.mrb[43].mxu0  ;;  %2552 = vmatpush3.bf16.msra.mxu1 %v2549_v28 }
 0x516   :  { %v2553_v31 = vpack.c.bf16 %v2198_v29, %v934_v30 }
 0x518   :  { %v2201_v32 = vpop.f32.mrb[44].mxu0  ;;  %2554 = vmatprep.subr.bf16.mxu1 %v2553_v31 }
 0x519   :  { %v944_v33 = vpop.f32.mrb[45].mxu0  ;;  %2556 = vmatpush3.bf16.msra.mxu1 %v2553_v31 }
 0x51a   :  { %v2557_v34 = vpack.c.bf16 %v2201_v32, %v944_v33 }
 0x51c   :  { %v2204_v35 = vpop.f32.mrb[46].mxu0  ;;  %2558 = vmatprep.subr.bf16.mxu1 %v2557_v34 }
 0x51d   :  { %v954_v36 = vpop.f32.mrb[47].mxu0  ;;  %2560 = vmatpush3.bf16.msra.mxu1 %v2557_v34 }
 0x51e   :  { %v2561_v37 = vpack.c.bf16 %v2204_v35, %v954_v36 }
 0x520   :  { %2562 = vmatprep.subr.bf16.mxu1 %v2561_v37 }
 0x521   :  { %2564 = vmatpush3.bf16.msra.mxu1 %v2561_v37 }
 0x524   :  { %2238 = vmatmul.mubr.f32.vlgmr.msra.gmra.mrb[32].mxu1 %v3029_v54 }
 0x525   :  { %2240 = vmatprep.mubr.f32.mxu1 %v3031_v55 }
 0x528   :  { %2241 = vmatmul.mubr.f32.gmra.mrb[34].mxu1 %v3035_v56 }
 0x529   :  { %2243 = vmatprep.mubr.f32.mxu1 %v3037_v57 }
 0x52c   :  { %2244 = vmatmul.mubr.f32.gmra.mrb[36].mxu1 %v3041_v58 }
 0x52d   :  { %2246 = vmatprep.mubr.f32.mxu1 %v3043_v59 }
 0x530   :  { %2247 = vmatmul.mubr.f32.gmra.mrb[38].mxu1 %v3047_v60 }
 0x531   :  { %2249 = vmatprep.mubr.f32.mxu1 %v3049_v61 }
 0x534   :  { %2250 = vmatmul.mubr.f32.gmra.mrb[40].mxu1 %v3053_v62 }
 0x535   :  { %2252 = vmatprep.mubr.f32.mxu1 %v3055_v63 }
 0x538   :  { %2253 = vmatmul.mubr.f32.gmra.mrb[42].mxu1 %v3059_v0 }
 0x539   :  { %2255 = vmatprep.mubr.f32.mxu1 %v3061_v1 }
 0x53c   :  { %2256 = vmatmul.mubr.f32.gmra.mrb[44].mxu1 %v3065_v2 }
 0x53d   :  { %2258 = vmatprep.mubr.f32.mxu1 %v3067_v3 }
 0x540   :  { %2259 = vmatmul.mubr.f32.gmra.mrb[46].mxu1 %v3071_v4 }
 0x541   :  { %2349 = vmatprep.mubr.f32.mxu1 %v3026_v8 }
 0x5f7   :  { %v2239_v41 = vpop.f32.mrb[32].mxu1 }
 0x5f8   :  { %v1029_v42 = vpop.f32.mrb[33].mxu1  ;;  %v1109_v44 = vmax.f32 %v2239_v41, 0.0 }
 0x5f9   :  { %v1108_v43 = vmax.f32 %v1029_v42, 0.0 }
 0x5fb   :  { %v2242_v45 = vpop.f32.mrb[34].mxu1  ;;  %2293 = vmatprep.mubr.f32.mxu0 %v1108_v43 }
 0x5fc   :  { %v1039_v46 = vpop.f32.mrb[35].mxu1  ;;  %2294 = vmatmul.mubr.f32.vlgmr.msra.gmra.mrb[48].mxu0 %v1109_v44  ;;  %v1111_v48 = vmax.f32 %v2242_v45, 0.0 }
 0x5fd   :  { %v1110_v47 = vmax.f32 %v1039_v46, 0.0 }
 0x5ff   :  { %v2245_v49 = vpop.f32.mrb[36].mxu1  ;;  %2296 = vmatprep.mubr.f32.mxu0 %v1110_v47 }
 0x600   :  { %v1049_v50 = vpop.f32.mrb[37].mxu1  ;;  %2297 = vmatmul.mubr.f32.gmra.mrb[50].mxu0 %v1111_v48  ;;  %v1113_v51 = vmax.f32 %v2245_v49, 0.0 }
 0x601   :  { %v1112_v8 = vmax.f32 %v1049_v50, 0.0 }
 0x603   :  { %v2248_v52 = vpop.f32.mrb[38].mxu1  ;;  %2299 = vmatprep.mubr.f32.mxu0 %v1112_v8 }
 0x604   :  { %v1059_v53 = vpop.f32.mrb[39].mxu1  ;;  %2300 = vmatmul.mubr.f32.gmra.mrb[52].mxu0 %v1113_v51  ;;  %v1115_v6 = vmax.f32 %v2248_v52, 0.0 }
 0x605   :  { %v1114_v5 = vmax.f32 %v1059_v53, 0.0 }
 0x607   :  { %v2251_v7 = vpop.f32.mrb[40].mxu1  ;;  %2302 = vmatprep.mubr.f32.mxu0 %v1114_v5 }
 0x608   :  { %v1069_v9 = vpop.f32.mrb[41].mxu1  ;;  %2303 = vmatmul.mubr.f32.gmra.mrb[54].mxu0 %v1115_v6  ;;  %v1117_v11 = vmax.f32 %v2251_v7, 0.0 }
 0x609   :  { %v1116_v10 = vmax.f32 %v1069_v9, 0.0 }
 0x60b   :  { %v2254_v12 = vpop.f32.mrb[42].mxu1  ;;  %2305 = vmatprep.mubr.f32.mxu0 %v1116_v10 }
 0x60c   :  { %v1079_v13 = vpop.f32.mrb[43].mxu1  ;;  %2306 = vmatmul.mubr.f32.gmra.mrb[56].mxu0 %v1117_v11  ;;  %v1119_v15 = vmax.f32 %v2254_v12, 0.0 }
 0x60d   :  { %v1118_v14 = vmax.f32 %v1079_v13, 0.0 }
 0x60f   :  { %v2257_v16 = vpop.f32.mrb[44].mxu1  ;;  %2308 = vmatprep.mubr.f32.mxu0 %v1118_v14 }
 0x610   :  { %v1089_v17 = vpop.f32.mrb[45].mxu1  ;;  %2309 = vmatmul.mubr.f32.gmra.mrb[58].mxu0 %v1119_v15  ;;  %v1121_v19 = vmax.f32 %v2257_v16, 0.0 }
 0x611   :  { %v1120_v18 = vmax.f32 %v1089_v17, 0.0 }
 0x613   :  { %v2260_v20 = vpop.f32.mrb[46].mxu1  ;;  %2311 = vmatprep.mubr.f32.mxu0 %v1120_v18 }
 0x614   :  { %v1099_v21 = vpop.f32.mrb[47].mxu1  ;;  %2312 = vmatmul.mubr.f32.gmra.mrb[60].mxu0 %v1121_v19  ;;  %v1123_v23 = vmax.f32 %v2260_v20, 0.0 }
 0x615   :  { %v1122_v22 = vmax.f32 %v1099_v21, 0.0 }
 0x617   :  { %2314 = vmatprep.mubr.f32.mxu0 %v1122_v22 }
 0x618   :  { %2315 = vmatmul.mubr.f32.gmra.mrb[62].mxu0 %v1123_v23 }
 0x6cf   :  { %v2295_v24 = vpop.f32.mrb[48].mxu0 }
 0x6d0   :  { %v1206_v25 = vpop.f32.mrb[49].mxu0 }
 0x6d1   :  { %v2597_v26 = vpack.c.bf16 %v2295_v24, %v1206_v25 }
 0x6d3   :  { %v2298_v27 = vpop.f32.mrb[50].mxu0  ;;  %2598 = vmatprep.subr.bf16.mxu1 %v2597_v26 }
 0x6d4   :  { %v1216_v28 = vpop.f32.mrb[51].mxu0  ;;  %2600 = vmatpush3.bf16.msra.mxu1 %v2597_v26 }
 0x6d5   :  { %v2601_v29 = vpack.c.bf16 %v2298_v27, %v1216_v28 }
 0x6d7   :  { %v2301_v30 = vpop.f32.mrb[52].mxu0  ;;  %2602 = vmatprep.subr.bf16.mxu1 %v2601_v29 }
 0x6d8   :  { %v1226_v31 = vpop.f32.mrb[53].mxu0  ;;  %2604 = vmatpush3.bf16.msra.mxu1 %v2601_v29 }
 0x6d9   :  { %v2605_v32 = vpack.c.bf16 %v2301_v30, %v1226_v31 }
 0x6db   :  { %v2304_v33 = vpop.f32.mrb[54].mxu0  ;;  %2606 = vmatprep.subr.bf16.mxu1 %v2605_v32 }
 0x6dc   :  { %v1236_v34 = vpop.f32.mrb[55].mxu0  ;;  %2608 = vmatpush3.bf16.msra.mxu1 %v2605_v32 }
 0x6dd   :  { %v2609_v35 = vpack.c.bf16 %v2304_v33, %v1236_v34 }
 0x6df   :  { %v2307_v36 = vpop.f32.mrb[56].mxu0  ;;  %2610 = vmatprep.subr.bf16.mxu1 %v2609_v35 }
 0x6e0   :  { %v1246_v37 = vpop.f32.mrb[57].mxu0  ;;  %2612 = vmatpush3.bf16.msra.mxu1 %v2609_v35 }
 0x6e1   :  { %v2613_v38 = vpack.c.bf16 %v2307_v36, %v1246_v37 }
 0x6e3   :  { %v2310_v39 = vpop.f32.mrb[58].mxu0  ;;  %2614 = vmatprep.subr.bf16.mxu1 %v2613_v38 }
 0x6e4   :  { %v1256_v40 = vpop.f32.mrb[59].mxu0  ;;  %2616 = vmatpush3.bf16.msra.mxu1 %v2613_v38 }
 0x6e5   :  { %v2617_v41 = vpack.c.bf16 %v2310_v39, %v1256_v40 }
 0x6e7   :  { %v2313_v42 = vpop.f32.mrb[60].mxu0  ;;  %2618 = vmatprep.subr.bf16.mxu1 %v2617_v41 }
 0x6e8   :  { %v1266_v43 = vpop.f32.mrb[61].mxu0  ;;  %2620 = vmatpush3.bf16.msra.mxu1 %v2617_v41 }
 0x6e9   :  { %v2621_v44 = vpack.c.bf16 %v2313_v42, %v1266_v43 }
 0x6eb   :  { %v2316_v45 = vpop.f32.mrb[62].mxu0  ;;  %2622 = vmatprep.subr.bf16.mxu1 %v2621_v44 }
 0x6ec   :  { %v1276_v46 = vpop.f32.mrb[63].mxu0  ;;  %2624 = vmatpush3.bf16.msra.mxu1 %v2621_v44 }
 0x6ed   :  { %v2625_v47 = vpack.c.bf16 %v2316_v45, %v1276_v46 }
 0x6ef   :  { %2626 = vmatprep.subr.bf16.mxu1 %v2625_v47 }
 0x6f0   :  { %2628 = vmatpush3.bf16.msra.mxu1 %v2625_v47 }
 0x6f3   :  { %2350 = vmatmul.mubr.f32.vlgmr.msra.gmra.mrb[48].mxu1 %v3029_v54  ;;  %v1437_v54 = vlaneseq }
 0x6f4   :  { %2352 = vmatprep.mubr.f32.mxu1 %v3031_v55 }
 0x6f5   :  { %v3106_v55 = vand.u32 127, %v1437_v54 }
 0x6f7   :  { %2353 = vmatmul.mubr.f32.gmra.mrb[50].mxu1 %v3035_v56  ;;  %v1668_v56 = vld [vmem:[%s3309_s6] ss:$0 sm:$0xff]  ;;  %vm1439_vm0 = vcmp.lt.s32.totalorder %v3106_v55, 16  ;;  %s2874_s6 = smov [#allocation13]  }
 0x6f8   :  { %2355 = vmatprep.mubr.f32.mxu1 %v3037_v57  ;;  %s1653_s25 = sshll.u32 %s2874_s6, 4  ;;  %s1654_s25 = int_to_ptr.vmem [resolvable:$true] %s1653_s25 }
 0x6f9   :  { %s2834_s26 = scalar_lea.vmem %s1654_s25, 2048  ;;  %p2839_p7 = scmp.lt.s32.totalorder %s1654_s25, %s1654_s25 }
 0x6fa   :  { %p2835_p6 = scmp.ne.s32.totalorder %s1654_s25, %s2834_s26  ;;  %p2840_p8 = scmp.lt.s32.totalorder %s2834_s26, %s2834_s26 }
 0x6fb   :  { %2356 = vmatmul.mubr.f32.gmra.mrb[52].mxu1 %v3041_v58 }
 0x6fc   :  { %2358 = vmatprep.mubr.f32.mxu1 %v3043_v59  ;;  %p2841_p9 = por %p2840_p8, %p2839_p7 }
 0x6fe   :  { %p2842_p10 = pnand %p2841_p9, %p2835_p6 }
 0x6ff   :  { %2359 = vmatmul.mubr.f32.gmra.mrb[54].mxu1 %v3047_v60 }
 0x700   :  { %2361 = vmatprep.mubr.f32.mxu1 %v3049_v61 }
 0x703   :  { %2362 = vmatmul.mubr.f32.gmra.mrb[56].mxu1 %v3053_v62 }
 0x704   :  { %2364 = vmatprep.mubr.f32.mxu1 %v3055_v63 }
 0x707   :  { %2365 = vmatmul.mubr.f32.gmra.mrb[58].mxu1 %v3059_v0 }
 0x708   :  { %2367 = vmatprep.mubr.f32.mxu1 %v3061_v1 }
 0x70b   :  { %2368 = vmatmul.mubr.f32.gmra.mrb[60].mxu1 %v3065_v2 }
 0x70c   :  { %2370 = vmatprep.mubr.f32.mxu1 %v3067_v3 }
 0x70f   :  { %2371 = vmatmul.mubr.f32.gmra.mrb[62].mxu1 %v3071_v4 }
 0x7c6   :  { %v2351_v57 = vpop.f32.mrb[48].mxu1 }
 0x7c7   :  { %v1364_v58 = vadd.f32 %v2351_v57, %v1668_v56  ;;  %v1358_v59 = vpop.f32.mrb[49].mxu1 }
 0x7c8   :  { %v1359_v60 = vadd.f32 %v1668_v56, %v1358_v59 }
 0x7c9   :  { %v3114_v61 = vsel %vm1439_vm0, %v1364_v58, -1e+30 }
 0x7ca   :  { %1458 = vmax.xlane.f32.xlu0 %v3114_v61  ;;  %v2354_v62 = vpop.f32.mrb[50].mxu1  ;;  %v3123_v3 = vsel %vm1439_vm0, %v1359_v60, -1e+30 }
 0x7cb   :  { %v1374_v63 = vadd.f32 %v2354_v62, %v1668_v56  ;;  %v1368_v0 = vpop.f32.mrb[51].mxu1 }
 0x7cc   :  { %v1369_v1 = vadd.f32 %v1668_v56, %v1368_v0 }
 0x7cd   :  { %v3119_v2 = vsel %vm1439_vm0, %v1374_v63, -1e+30 }
 0x7ce   :  { %1462 = vmax.xlane.f32.xlu1 %v3119_v2  ;;  %v2357_v4 = vpop.f32.mrb[52].mxu1  ;;  %1456 = vmax.xlane.f32.xlu0 %v3123_v3  ;;  %v3129_v8 = vsel %vm1439_vm0, %v1369_v1, -1e+30 }
 0x7cf   :  { %v1384_v48 = vadd.f32 %v2357_v4, %v1668_v56  ;;  %v1378_v49 = vpop.f32.mrb[53].mxu1 }
 0x7d0   :  { %v1379_v50 = vadd.f32 %v1668_v56, %v1378_v49 }
 0x7d1   :  { %v3139_v6 = vsel %vm1439_vm0, %v1384_v48, -1e+30 }
 0x7d2   :  { %v2360_v51 = vpop.f32.mrb[54].mxu1  ;;  %1460 = vmax.xlane.f32.xlu1 %v3129_v8  ;;  %v3134_v52 = vsel %vm1439_vm0, %v1379_v50, -1e+30 }
 0x7d3   :  { %v1394_v53 = vadd.f32 %v2360_v51, %v1668_v56  ;;  %v1388_v5 = vpop.f32.mrb[55].mxu1  ;;  %1464 = vmax.xlane.f32.xlu0 %v3134_v52 }
 0x7d4   :  { %v1389_v7 = vadd.f32 %v1668_v56, %v1388_v5 }
 0x7d5   :  { %v3149_v13 = vsel %vm1439_vm0, %v1394_v53, -1e+30 }
 0x7d6   :  { %v2363_v9 = vpop.f32.mrb[56].mxu1  ;;  %1466 = vmax.xlane.f32.xlu1 %v3139_v6  ;;  %v3144_v10 = vsel %vm1439_vm0, %v1389_v7, -1e+30 }
 0x7d7   :  { %v1404_v11 = vadd.f32 %v2363_v9, %v1668_v56  ;;  %v1398_v12 = vpop.f32.mrb[57].mxu1  ;;  %1468 = vmax.xlane.f32.xlu0 %v3144_v10 }
 0x7d8   :  { %v1399_v14 = vadd.f32 %v1668_v56, %v1398_v12 }
 0x7d9   :  { %v3159_v19 = vsel %vm1439_vm0, %v1404_v11, -1e+30 }
 0x7da   :  { %v2366_v15 = vpop.f32.mrb[58].mxu1  ;;  %1470 = vmax.xlane.f32.xlu1 %v3149_v13  ;;  %v3154_v16 = vsel %vm1439_vm0, %v1399_v14, -1e+30 }
 0x7db   :  { %v1414_v17 = vadd.f32 %v2366_v15, %v1668_v56  ;;  %v1408_v18 = vpop.f32.mrb[59].mxu1  ;;  %1472 = vmax.xlane.f32.xlu0 %v3154_v16 }
 0x7dc   :  { %v1409_v20 = vadd.f32 %v1668_v56, %v1408_v18 }
 0x7dd   :  { %v3169_v25 = vsel %vm1439_vm0, %v1414_v17, -1e+30 }
 0x7de   :  { %v2369_v21 = vpop.f32.mrb[60].mxu1  ;;  %1474 = vmax.xlane.f32.xlu1 %v3159_v19  ;;  %v3164_v22 = vsel %vm1439_vm0, %v1409_v20, -1e+30 }
 0x7df   :  { %v1424_v23 = vadd.f32 %v2369_v21, %v1668_v56  ;;  %v1418_v24 = vpop.f32.mrb[61].mxu1  ;;  %1476 = vmax.xlane.f32.xlu0 %v3164_v22 }
 0x7e0   :  { %v1419_v26 = vadd.f32 %v1668_v56, %v1418_v24 }
 0x7e1   :  { %v3179_v31 = vsel %vm1439_vm0, %v1424_v23, -1e+30 }
 0x7e2   :  { %v2372_v27 = vpop.f32.mrb[62].mxu1  ;;  %1478 = vmax.xlane.f32.xlu1 %v3169_v25  ;;  %v3174_v28 = vsel %vm1439_vm0, %v1419_v26, -1e+30 }
 0x7e3   :  { %v1434_v29 = vadd.f32 %v2372_v27, %v1668_v56  ;;  %v1428_v30 = vpop.f32.mrb[63].mxu1  ;;  %1480 = vmax.xlane.f32.xlu0 %v3174_v28 }
 0x7e4   :  { %v1429_v32 = vadd.f32 %v1668_v56, %v1428_v30 }
 0x7e5   :  { %v3189_v34 = vsel %vm1439_vm0, %v1434_v29, -1e+30 }
 0x7e6   :  { %1482 = vmax.xlane.f32.xlu1 %v3179_v31  ;;  %v3184_v33 = vsel %vm1439_vm0, %v1429_v32, -1e+30 }
 0x7e7   :  { %1484 = vmax.xlane.f32.xlu0 %v3184_v33 }
 0x7ea   :  { %1486 = vmax.xlane.f32.xlu1 %v3189_v34 }
 0x857   :  { %v3192_v35 = vpop.xlane.xlu0 %1458 }
 0x858   :  { %v1489_v36 = vsub.f32 %v3114_v61, %v3192_v35 }
 0x85a   :  { %v1506_v37 = vmul.f32 1.442695, %v1489_v36 }
 0x85b   :  { %v3196_v38 = vpop.xlane.xlu1 %1462  ;;  %v3198_v39 = vpop.xlane.xlu0 %1456 }
 0x85c   :  { %2638 = vpow2.f32 %v1506_v37  ;;  %v1491_v40 = vsub.f32 %v3119_v2, %v3196_v38  ;;  %v1488_v41 = vsub.f32 %v3123_v3, %v3198_v39 }
 0x85e   :  { %v1510_v42 = vmul.f32 1.442695, %v1491_v40  ;;  %v1504_v43 = vmul.f32 1.442695, %v1488_v41 }
 0x85f   :  { %v3204_v44 = vpop.xlane.xlu1 %1460 }
 0x860   :  { %2640 = vpow2.f32 %v1510_v42  ;;  %v1490_v45 = vsub.f32 %v3129_v8, %v3204_v44  ;;  %v3208_v46 = vpop.xlane.xlu0 %1464 }
 0x861   :  { %2642 = vpow2.f32 %v1504_v43  ;;  %v1492_v47 = vsub.f32 %v3134_v52, %v3208_v46 }
 0x862   :  { %v1508_v54 = vmul.f32 1.442695, %v1490_v45 }
 0x863   :  { %v3212_v55 = vpop.xlane.xlu1 %1466  ;;  %v1512_v58 = vmul.f32 1.442695, %v1492_v47 }
 0x864   :  { %2644 = vpow2.f32 %v1508_v54  ;;  %v1493_v56 = vsub.f32 %v3139_v6, %v3212_v55  ;;  %v3216_v57 = vpop.xlane.xlu0 %1468 }
 0x865   :  { %v1494_v59 = vsub.f32 %v3144_v10, %v3216_v57 }
 0x866   :  { %v2639_v60 = vpop.eup %2638  ;;  %v1514_v62 = vmul.f32 1.442695, %v1493_v56 }
 0x867   :  { %1538 = vadd.xlane.f32.xlu1 %v2639_v60  ;;  %v3220_v63 = vpop.xlane.xlu1 %1470  ;;  %v1516_v4 = vmul.f32 1.442695, %v1494_v59 }
 0x868   :  { %2646 = vpow2.f32 %v1514_v62  ;;  %v1495_v0 = vsub.f32 %v3149_v13, %v3220_v63  ;;  %v3224_v1 = vpop.xlane.xlu0 %1472 }
 0x869   :  { %2648 = vpow2.f32 %v1512_v58  ;;  %v1496_v48 = vsub.f32 %v3154_v16, %v3224_v1 }
 0x86a   :  { %v2641_v49 = vpop.eup %2640  ;;  %v1518_v50 = vmul.f32 1.442695, %v1495_v0 }
 0x86b   :  { %v2643_v51 = vpop.eup %2642  ;;  %1542 = vadd.xlane.f32.xlu1 %v2641_v49  ;;  %v3228_v53 = vpop.xlane.xlu1 %1474  ;;  %v1520_v9 = vmul.f32 1.442695, %v1496_v48 }
 0x86c   :  { %2650 = vpow2.f32 %v1518_v50  ;;  %v1497_v5 = vsub.f32 %v3159_v19, %v3228_v53  ;;  %1536 = vadd.xlane.f32.xlu0 %v2643_v51  ;;  %v3232_v7 = vpop.xlane.xlu0 %1476 }
 0x86d   :  { %2652 = vpow2.f32 %v1516_v4  ;;  %v1498_v11 = vsub.f32 %v3164_v22, %v3232_v7 }
 0x86e   :  { %v2645_v12 = vpop.eup %2644  ;;  %v1522_v14 = vmul.f32 1.442695, %v1497_v5 }
 0x86f   :  { %v3236_v15 = vpop.xlane.xlu1 %1478  ;;  %v1524_v20 = vmul.f32 1.442695, %v1498_v11 }
 0x870   :  { %2654 = vpow2.f32 %v1522_v14  ;;  %v1499_v17 = vsub.f32 %v3169_v25, %v3236_v15  ;;  %1540 = vadd.xlane.f32.xlu0 %v2645_v12  ;;  %v3240_v18 = vpop.xlane.xlu0 %1480 }
 0x871   :  { %2656 = vpow2.f32 %v1520_v9  ;;  %v1500_v21 = vsub.f32 %v3174_v28, %v3240_v18 }
 0x872   :  { %v2647_v23 = vpop.eup %2646  ;;  %v1526_v24 = vmul.f32 1.442695, %v1499_v17 }
 0x873   :  { %v2649_v26 = vpop.eup %2648  ;;  %1546 = vadd.xlane.f32.xlu1 %v2647_v23  ;;  %v3244_v27 = vpop.xlane.xlu1 %1482  ;;  %v1528_v32 = vmul.f32 1.442695, %v1500_v21 }
 0x874   :  { %2658 = vpow2.f32 %v1526_v24  ;;  %v1501_v29 = vsub.f32 %v3179_v31, %v3244_v27  ;;  %1544 = vadd.xlane.f32.xlu0 %v2649_v26  ;;  %v3248_v30 = vpop.xlane.xlu0 %1484 }
 0x875   :  { %2660 = vpow2.f32 %v1524_v20  ;;  %v1502_v36 = vsub.f32 %v3184_v33, %v3248_v30 }
 0x876   :  { %v2651_v37 = vpop.eup %2650  ;;  %v1530_v40 = vmul.f32 1.442695, %v1501_v29 }
 0x877   :  { %v2653_v41 = vpop.eup %2652  ;;  %1550 = vadd.xlane.f32.xlu1 %v2651_v37  ;;  %v3252_v42 = vpop.xlane.xlu1 %1486  ;;  %v1532_v45 = vmul.f32 1.442695, %v1502_v36 }
 0x878   :  { %2662 = vpow2.f32 %v1530_v40  ;;  %v1503_v43 = vsub.f32 %v3189_v34, %v3252_v42  ;;  %1548 = vadd.xlane.f32.xlu0 %v2653_v41 }
 0x879   :  { %2664 = vpow2.f32 %v1528_v32 }
 0x87a   :  { %v2655_v47 = vpop.eup %2654  ;;  %v1534_v54 = vmul.f32 1.442695, %v1503_v43 }
 0x87b   :  { %v2657_v56 = vpop.eup %2656  ;;  %1554 = vadd.xlane.f32.xlu1 %v2655_v47 }
 0x87c   :  { %2666 = vpow2.f32 %v1534_v54  ;;  %1552 = vadd.xlane.f32.xlu0 %v2657_v56 }
 0x87d   :  { %2668 = vpow2.f32 %v1532_v45 }
 0x87e   :  { %v2659_v58 = vpop.eup %2658 }
 0x87f   :  { %v2661_v59 = vpop.eup %2660  ;;  %1558 = vadd.xlane.f32.xlu1 %v2659_v58 }
 0x880   :  { %1556 = vadd.xlane.f32.xlu0 %v2661_v59 }
 0x882   :  { %v2663_v60 = vpop.eup %2662 }
 0x883   :  { %v2665_v62 = vpop.eup %2664  ;;  %1562 = vadd.xlane.f32.xlu1 %v2663_v60 }
 0x884   :  { %1560 = vadd.xlane.f32.xlu0 %v2665_v62 }
 0x886   :  { %v2667_v0 = vpop.eup %2666 }
 0x887   :  { %v2669_v4 = vpop.eup %2668  ;;  %1566 = vadd.xlane.f32.xlu1 %v2667_v0 }
 0x888   :  { %1564 = vadd.xlane.f32.xlu0 %v2669_v4 }
 0x8f4   :  { %v1539_v48 = vpop.xlane.xlu1 %1538 }
 0x8f5   :  { %2670 = vlog2.f32 %v1539_v48 }
 0x8f8   :  { %v1543_v49 = vpop.xlane.xlu1 %1542 }
 0x8f9   :  { %2672 = vlog2.f32 %v1543_v49  ;;  %v1537_v50 = vpop.xlane.xlu0 %1536 }
 0x8fa   :  { %2674 = vlog2.f32 %v1537_v50 }
 0x8fd   :  { %v1541_v51 = vpop.xlane.xlu0 %1540 }
 0x8fe   :  { %2676 = vlog2.f32 %v1541_v51 }
 0x8ff   :  { %v2671_v5 = vpop.eup %2670 }
 0x900   :  { %v1571_v9 = vmul.f32 0.6931472, %v2671_v5  ;;  %v1547_v11 = vpop.xlane.xlu1 %1546 }
 0x901   :  { %2678 = vlog2.f32 %v1547_v11  ;;  %v1545_v12 = vpop.xlane.xlu0 %1544 }
 0x902   :  { %v1601_v14 = vadd.f32 %v1571_v9, %v3192_v35  ;;  %2680 = vlog2.f32 %v1545_v12 }
 0x903   :  { %v2673_v17 = vpop.eup %2672 }
 0x904   :  { %v2675_v20 = vpop.eup %2674  ;;  %v1617_v21 = vsub.f32 %v3114_v61, %v1601_v14  ;;  %v1575_v23 = vmul.f32 0.6931472, %v2673_v17  ;;  %v1551_v24 = vpop.xlane.xlu1 %1550 }
 0x905   :  { %v1569_v26 = vmul.f32 0.6931472, %v2675_v20  ;;  %2682 = vlog2.f32 %v1551_v24  ;;  %v1549_v29 = vpop.xlane.xlu0 %1548 }
 0x906   :  { %1633 = vst [vmem:[#allocation13 + $0x8] sm:$0xff] %v1617_v21  ;;  %v1603_v32 = vadd.f32 %v1575_v23, %v3196_v38  ;;  %2684 = vlog2.f32 %v1549_v29 }
 0x907   :  { %v1600_v36 = vadd.f32 %v1569_v26, %v3198_v39 }
 0x908   :  { %v2677_v37 = vpop.eup %2676  ;;  %v1619_v40 = vsub.f32 %v3119_v2, %v1603_v32  ;;  %v1555_v35 = vpop.xlane.xlu1 %1554 }
 0x909   :  { %v1616_v41 = vsub.f32 %v3123_v3, %v1600_v36  ;;  %v1573_v43 = vmul.f32 0.6931472, %v2677_v37  ;;  %2686 = vlog2.f32 %v1555_v35  ;;  %v1553_v61 = vpop.xlane.xlu0 %1552 }
 0x90a   :  { %1635 = vst [vmem:[#allocation13 + $0x18] sm:$0xff] %v1619_v40  ;;  %2688 = vlog2.f32 %v1553_v61 }
 0x90b   :  { %v2679_v45 = vpop.eup %2678  ;;  %1632 = vst [vmem:[#allocation13] sm:$0xff] %v1616_v41  ;;  %v1602_v47 = vadd.f32 %v1573_v43, %v3204_v44 }
 0x90c   :  { %v2681_v54 = vpop.eup %2680  ;;  %v1579_v38 = vmul.f32 0.6931472, %v2679_v45  ;;  %v1559_v56 = vpop.xlane.xlu1 %1558 }
 0x90d   :  { %v1618_v39 = vsub.f32 %v3129_v8, %v1602_v47  ;;  %v1577_v58 = vmul.f32 0.6931472, %v2681_v54  ;;  %2690 = vlog2.f32 %v1559_v56  ;;  %v1557_v2 = vpop.xlane.xlu0 %1556 }
 0x90e   :  { %v1605_v59 = vadd.f32 %v1579_v38, %v3212_v55  ;;  %2692 = vlog2.f32 %v1557_v2 }
 0x90f   :  { %v2683_v3 = vpop.eup %2682  ;;  %1634 = vst [vmem:[#allocation13 + $0x10] sm:$0xff] %v1618_v39  ;;  %v1604_v60 = vadd.f32 %v1577_v58, %v3208_v46 }
 0x910   :  { %v2685_v62 = vpop.eup %2684  ;;  %v1621_v0 = vsub.f32 %v3139_v6, %v1605_v59  ;;  %v1583_v4 = vmul.f32 0.6931472, %v2683_v3  ;;  %v1563_v44 = vpop.xlane.xlu1 %1562 }
 0x911   :  { %v1620_v48 = vsub.f32 %v3134_v52, %v1604_v60  ;;  %v1581_v49 = vmul.f32 0.6931472, %v2685_v62  ;;  %2694 = vlog2.f32 %v1563_v44  ;;  %v1561_v8 = vpop.xlane.xlu0 %1560 }
 0x912   :  { %1637 = vst [vmem:[#allocation13 + $0x28] sm:$0xff] %v1621_v0  ;;  %v1607_v50 = vadd.f32 %v1583_v4, %v3220_v63  ;;  %2696 = vlog2.f32 %v1561_v8 }
 0x913   :  { %v2687_v55 = vpop.eup %2686  ;;  %1636 = vst [vmem:[#allocation13 + $0x20] sm:$0xff] %v1620_v48  ;;  %v1606_v51 = vadd.f32 %v1581_v49, %v3216_v57 }
 0x914   :  { %v2689_v5 = vpop.eup %2688  ;;  %v1623_v46 = vsub.f32 %v3149_v13, %v1607_v50  ;;  %v1587_v9 = vmul.f32 0.6931472, %v2687_v55  ;;  %v1567_v6 = vpop.xlane.xlu1 %1566 }
 0x915   :  { %v1622_v11 = vsub.f32 %v3144_v10, %v1606_v51  ;;  %v1585_v12 = vmul.f32 0.6931472, %v2689_v5  ;;  %2698 = vlog2.f32 %v1567_v6  ;;  %v1565_v52 = vpop.xlane.xlu0 %1564 }
 0x916   :  { %1639 = vst [vmem:[#allocation13 + $0x38] sm:$0xff] %v1623_v46  ;;  %v1609_v14 = vadd.f32 %v1587_v9, %v3228_v53  ;;  %2700 = vlog2.f32 %v1565_v52 }
 0x917   :  { %v2691_v63 = vpop.eup %2690  ;;  %1638 = vst [vmem:[#allocation13 + $0x30] sm:$0xff] %v1622_v11  ;;  %v1608_v17 = vadd.f32 %v1585_v12, %v3224_v1 }
 0x918   :  { %v2693_v20 = vpop.eup %2692  ;;  %v1625_v57 = vsub.f32 %v3159_v19, %v1609_v14  ;;  %v1591_v21 = vmul.f32 0.6931472, %v2691_v63 }
 0x919   :  { %v1624_v13 = vsub.f32 %v3154_v16, %v1608_v17  ;;  %v1589_v23 = vmul.f32 0.6931472, %v2693_v20 }
 0x91a   :  { %1641 = vst [vmem:[#allocation13 + $0x48] sm:$0xff] %v1625_v57  ;;  %v1611_v10 = vadd.f32 %v1591_v21, %v3236_v15 }
 0x91b   :  { %v2695_v24 = vpop.eup %2694  ;;  %1640 = vst [vmem:[#allocation13 + $0x40] sm:$0xff] %v1624_v13  ;;  %v1610_v26 = vadd.f32 %v1589_v23, %v3232_v7 }
 0x91c   :  { %v2697_v53 = vpop.eup %2696  ;;  %v1627_v29 = vsub.f32 %v3169_v25, %v1611_v10  ;;  %v1595_v32 = vmul.f32 0.6931472, %v2695_v24 }
 0x91d   :  { %v1626_v1 = vsub.f32 %v3164_v22, %v1610_v26  ;;  %v1593_v36 = vmul.f32 0.6931472, %v2697_v53 }
 0x91e   :  { %1643 = vst [vmem:[#allocation13 + $0x58] sm:$0xff] %v1627_v29  ;;  %v1613_v19 = vadd.f32 %v1595_v32, %v3244_v27 }
 0x91f   :  { %v2699_v37 = vpop.eup %2698  ;;  %1642 = vst [vmem:[#allocation13 + $0x50] sm:$0xff] %v1626_v1  ;;  %v1612_v16 = vadd.f32 %v1593_v36, %v3240_v18 }
 0x920   :  { %v2701_v40 = vpop.eup %2700  ;;  %v1629_v15 = vsub.f32 %v3179_v31, %v1613_v19  ;;  %v1599_v35 = vmul.f32 0.6931472, %v2699_v37 }
 0x921   :  { %v1628_v7 = vsub.f32 %v3174_v28, %v1612_v16  ;;  %v1597_v41 = vmul.f32 0.6931472, %v2701_v40 }
 0x922   :  { %1645 = vst [vmem:[#allocation13 + $0x68] sm:$0xff] %v1629_v15  ;;  %v1615_v25 = vadd.f32 %v1599_v35, %v3252_v42 }
 0x923   :  { %1644 = vst [vmem:[#allocation13 + $0x60] sm:$0xff] %v1628_v7  ;;  %v1614_v22 = vadd.f32 %v1597_v41, %v3248_v30 }
 0x924   :  { %v1631_v27 = vsub.f32 %v3189_v34, %v1615_v25 }
 0x925   :  { %v1630_v43 = vsub.f32 %v3184_v33, %v1614_v22 }
 0x926   :  { %1647 = vst [vmem:[#allocation13 + $0x78] sm:$0xff] %v1631_v27 }
 0x927   :  { %1646 = vst [vmem:[#allocation13 + $0x70] sm:$0xff] %v1630_v43 }
 0x928   :  { %2845 = shalt.err (!%p2842_p10)
}
 0x929   :  { %s2846_s8 = scalar_lea.hbm %s3310_s7, 2048 }
 0x92a   :  { %p2847_p11 = scmp.ne.s32.totalorder %s3310_s7, %s2846_s8  ;;  %p2850_p12 = scmp.lt.u32.totalorder %s2846_s8, %s3310_s7 }
 0x92c   :  { %p2852_p13 = pnand %p2850_p12, %p2847_p11 }
 0x92e   :  { %2855 = shalt.err (!%p2852_p13)
}
 0x92f   :  { %1659 = dma.vmem_to_hbm [thread:$0]  %s1654_s25, 2048, %s3310_s7, [#allocation4], %s2868_s13, %s2868_s13, %s2869_s14  }
 0x930   :  { %2864 = dma.done.wait [#allocation4], 2048  }
 0x931   :  { %2865 = vsyncadd [#allocation4], 4294965248 }
 0x932   :  { %1663 = vsyncpa [#allocation3], 1 }
 0x933   :  { %1664 = vsyncpa [#allocation6], 1 }
 0x934   :  { %1665 = vsyncpa [#allocation9], 1 }
 0x935   :  { %1666 = vsyncpa [#allocation12], 1 }
 0x936   :  { %1667 = vsyncpa [#allocation4], 1 }

</bundles_post_ra>
